<compile_context>
chip_gen: v7x
topology: tpu7x:2x2x1
jax: 0.10.0
libtpu: 0.0.40
codegen_flags: <defaults>
</compile_context>

<pallas_src>
import functools

import jax
import jax.numpy as jnp
from jax.experimental import pallas as pl
from jax.experimental.pallas import tpu as pltpu

IN_DIM = 28 * 28    # 784
HID = 512
OUT_DIM = 10
OUT_PAD = 128       # lane-dense padded logits width (multiple of 128)


def mlp_kernel(x_ref, w1_ref, b1_ref, w2_ref, b2_ref, w3_ref, b3_ref, o_ref):
    # x arrives fp32 straight from HBM; cast to bf16 in-VMEM (no separate XLA
    # convert pass over x).
    x = x_ref[...].astype(jnp.bfloat16)
    # Layer 1: Linear(784 -> 512) + ReLU   (bf16 operands, fp32 accumulate)
    h1 = jnp.dot(x, w1_ref[...], preferred_element_type=jnp.float32)
    h1 = jnp.maximum(h1 + b1_ref[...], 0.0).astype(jnp.bfloat16)
    # Layer 2: Linear(512 -> 512) + ReLU
    h2 = jnp.dot(h1, w2_ref[...], preferred_element_type=jnp.float32)
    h2 = jnp.maximum(h2 + b2_ref[...], 0.0).astype(jnp.bfloat16)
    # Layer 3: Linear(512 -> 128-padded logits); columns >= 10 are zero weight/bias.
    logits = jnp.dot(h2, w3_ref[...], preferred_element_type=jnp.float32)
    o_ref[...] = (logits + b3_ref[...]).astype(o_ref.dtype)


def _round_up(x, m):
    return ((x + m - 1) // m) * m


@functools.partial(jax.jit, static_argnames=("tile_m",))
def neural_network_forward(x, params, *, tile_m=512):
    """x: (N, 1, 28, 28) float32 (NCHW, like torch). Returns (N, 10) fp32 logits.

    params: ((w1,b1),(w2,b2),(w3,b3)) with weights bf16 in (in, out) layout,
            layer 3 zero-padded to 128 output lanes, biases (1, out) fp32
            (see init_params / params_from_torch_layout).
    """
    (w1, b1), (w2, b2), (w3, b3) = params
    n = x.shape[0]
    x_flat = x.reshape(n, IN_DIM)                 # nn.Flatten(); stays fp32 in HBM

    # Batch tiling: small batches use one snug (16-rounded) tile; large batches
    # use tile_m rows per grid step with the weights VMEM-resident across steps.
    tm = min(tile_m, _round_up(n, 16))
    # Give the parallel batch axis >= 2 grid steps on big batches so v7x can
    # split work across its 2 TensorCores (no effect on v5e/v6e).
    if n >= 512 and pl.cdiv(n, tm) < 2:
        tm = _round_up(pl.cdiv(n, 2), 16)
    grid = (pl.cdiv(n, tm),)                      # ragged last block is masked

    flops = 2 * n * (IN_DIM * HID + HID * HID + HID * OUT_PAD)
    bytes_accessed = (
        x_flat.size * 4                                   # fp32 activations in
        + (w1.size + w2.size + w3.size) * 2               # bf16 weights
        + (b1.size + b2.size + b3.size) * 4               # fp32 biases
        + n * OUT_PAD * 4                                 # fp32 padded logits out
    )

    out = pl.pallas_call(
        mlp_kernel,
        out_shape=jax.ShapeDtypeStruct((n, OUT_PAD), jnp.float32),
        grid=grid,
        in_specs=[
            pl.BlockSpec((tm, IN_DIM), lambda i: (i, 0)),       # x tile (pipelined)
            pl.BlockSpec((IN_DIM, HID), lambda i: (0, 0)),      # w1 (VMEM-resident)
            pl.BlockSpec((1, HID), lambda i: (0, 0)),           # b1
            pl.BlockSpec((HID, HID), lambda i: (0, 0)),         # w2 (VMEM-resident)
            pl.BlockSpec((1, HID), lambda i: (0, 0)),           # b2
            pl.BlockSpec((HID, OUT_PAD), lambda i: (0, 0)),     # w3 padded (resident)
            pl.BlockSpec((1, OUT_PAD), lambda i: (0, 0)),       # b3 padded
        ],
        out_specs=pl.BlockSpec((tm, OUT_PAD), lambda i: (i, 0)),
        compiler_params=pltpu.CompilerParams(
            dimension_semantics=("parallel",),
        ),
        cost_estimate=pl.CostEstimate(
            flops=flops, transcendentals=0, bytes_accessed=bytes_accessed),
    )(x_flat, w1, b1, w2, b2, w3, b3)
    return out[:, :OUT_DIM]


def _pad_layer3(w3, b3):
    """Zero-pad layer-3 weights/bias from 10 to 128 output lanes (lane-dense out)."""
    w3p = jnp.zeros((HID, OUT_PAD), w3.dtype).at[:, :OUT_DIM].set(w3)
    b3p = jnp.zeros((1, OUT_PAD), jnp.float32).at[:, :OUT_DIM].set(
        b3.reshape(1, -1).astype(jnp.float32))
    return w3p, b3p


def params_from_torch_layout(torch_params):
    """Convert torch-style ((out,in) fp32 W, (out,) b) params ONCE to kernel layout."""
    converted = [
        (jnp.asarray(w).T.astype(jnp.bfloat16),
         jnp.asarray(b).reshape(1, -1).astype(jnp.float32))
        for w, b in torch_params
    ]
    (w1, b1), (w2, b2), (w3, b3) = converted
    w3, b3 = _pad_layer3(w3, b3)
    return ((w1, b1), (w2, b2), (w3, b3))


def init_params(key):
    """Deterministic init matching torch.nn.Linear (uniform +/- 1/sqrt(fan_in)),
    stored directly in kernel layout: W (in, out) bf16, b (1, out) fp32,
    layer 3 zero-padded to 128 output lanes."""
    def linear_init(k, fan_in, fan_out):
        k_w, k_b = jax.random.split(k)
        bound = 1.0 / jnp.sqrt(fan_in)
        w = jax.random.uniform(k_w, (fan_in, fan_out), jnp.float32, -bound, bound)
        b = jax.random.uniform(k_b, (1, fan_out), jnp.float32, -bound, bound)
        return w.astype(jnp.bfloat16), b

    k1, k2, k3 = jax.random.split(key, 3)
    p1 = linear_init(k1, IN_DIM, HID)
    p2 = linear_init(k2, HID, HID)
    w3, b3 = linear_init(k3, HID, OUT_DIM)
    w3, b3 = _pad_layer3(w3, b3)
    return (p1, p2, (w3, b3))


if __name__ == "__main__":
    key = jax.random.PRNGKey(0)
    k_x, k_p = jax.random.split(key)

    params = init_params(k_p)
    # Small batch, MNIST-shaped NCHW input like the PyTorch module expects.
    x = jax.random.normal(k_x, (8, 1, 28, 28), dtype=jnp.float32)

    logits = neural_network_forward(x, params)
    jax.block_until_ready(logits)

    # Pure-JAX reference computed with the same bf16 weights / fp32 accumulation.
    (w1, b1), (w2, b2), (w3, b3) = params
    xf = x.reshape(x.shape[0], -1).astype(jnp.bfloat16)
    r = jnp.maximum(jnp.dot(xf, w1, preferred_element_type=jnp.float32) + b1, 0.0)
    r = jnp.maximum(jnp.dot(r.astype(jnp.bfloat16), w2,
                            preferred_element_type=jnp.float32) + b2, 0.0)
    ref = (jnp.dot(r.astype(jnp.bfloat16), w3,
                   preferred_element_type=jnp.float32) + b3)[:, :OUT_DIM]

    assert logits.shape == (8, 10)
    assert logits.dtype == jnp.float32
    assert jnp.allclose(logits, ref, atol=2e-2, rtol=2e-2)

    print("KERNEL_OK")
</pallas_src>

<mosaic_0001>
module attributes {stable_mosaic.version = 11 : i64} {
  func.func @mlp_kernel(%arg0: i32, %arg1: memref<16x784xf32, #tpu.memory_space<vmem>>, %arg2: memref<784x512xbf16, #tpu.memory_space<vmem>>, %arg3: memref<1x512xf32, #tpu.memory_space<vmem>>, %arg4: memref<512x512xbf16, #tpu.memory_space<vmem>>, %arg5: memref<1x512xf32, #tpu.memory_space<vmem>>, %arg6: memref<512x128xbf16, #tpu.memory_space<vmem>>, %arg7: memref<1x128xf32, #tpu.memory_space<vmem>>, %arg8: memref<16x128xf32, #tpu.memory_space<vmem>>) attributes {dimension_semantics = [#tpu.dimension_semantics<parallel>], iteration_bounds = array<i64: 1>, scalar_prefetch = 0 : i64, scratch_operands = 0 : i64, tpu.core_type = #tpu.core_type<tc>, window_params = [{transform_indices = @transform_0, window_bounds = array<i64: 16, 784>}, {pipeline_mode = #tpu.pipeline_mode<synchronous>, transform_indices = @transform_1, window_bounds = array<i64: 784, 512>}, {pipeline_mode = #tpu.pipeline_mode<synchronous>, transform_indices = @transform_2, window_bounds = array<i64: 1, 512>}, {pipeline_mode = #tpu.pipeline_mode<synchronous>, transform_indices = @transform_3, window_bounds = array<i64: 512, 512>}, {pipeline_mode = #tpu.pipeline_mode<synchronous>, transform_indices = @transform_4, window_bounds = array<i64: 1, 512>}, {pipeline_mode = #tpu.pipeline_mode<synchronous>, transform_indices = @transform_5, window_bounds = array<i64: 512, 128>}, {pipeline_mode = #tpu.pipeline_mode<synchronous>, transform_indices = @transform_6, window_bounds = array<i64: 1, 128>}, {transform_indices = @transform_7, window_bounds = array<i64: 16, 128>}]} {
    %c0 = arith.constant 0 : index
    %c0_0 = arith.constant 0 : index
    %0 = vector.load %arg1[%c0, %c0_0] : memref<16x784xf32, #tpu.memory_space<vmem>>, vector<16x784xf32>
    %1 = arith.truncf %0 : vector<16x784xf32> to vector<16x784xbf16>
    %c0_1 = arith.constant 0 : index
    %c0_2 = arith.constant 0 : index
    %2 = vector.load %arg2[%c0_1, %c0_2] : memref<784x512xbf16, #tpu.memory_space<vmem>>, vector<784x512xbf16>
    %cst = arith.constant dense<0.000000e+00> : vector<16x512xf32>
    %3 = tpu.matmul %1, %2, %cst {dimension_numbers = #tpu.dot_dimension_numbers<[1], [0], [0], [1], [0, 0, 1, 1], [], []>} : vector<16x784xbf16>, vector<784x512xbf16>, vector<16x512xf32> -> vector<16x512xf32>
    %c0_3 = arith.constant 0 : index
    %c0_4 = arith.constant 0 : index
    %4 = vector.load %arg3[%c0_3, %c0_4] : memref<1x512xf32, #tpu.memory_space<vmem>>, vector<1x512xf32>
    %5 = vector.broadcast %4 : vector<1x512xf32> to vector<16x512xf32>
    %6 = arith.addf %3, %5 : vector<16x512xf32>
    %cst_5 = arith.constant 0.000000e+00 : f32
    %7 = vector.broadcast %cst_5 : f32 to vector<16x512xf32>
    %8 = arith.maximumf %6, %7 : vector<16x512xf32>
    %9 = arith.truncf %8 : vector<16x512xf32> to vector<16x512xbf16>
    %c0_6 = arith.constant 0 : index
    %c0_7 = arith.constant 0 : index
    %10 = vector.load %arg4[%c0_6, %c0_7] : memref<512x512xbf16, #tpu.memory_space<vmem>>, vector<512x512xbf16>
    %cst_8 = arith.constant dense<0.000000e+00> : vector<16x512xf32>
    %11 = tpu.matmul %9, %10, %cst_8 {dimension_numbers = #tpu.dot_dimension_numbers<[1], [0], [0], [1], [0, 0, 1, 1], [], []>} : vector<16x512xbf16>, vector<512x512xbf16>, vector<16x512xf32> -> vector<16x512xf32>
    %c0_9 = arith.constant 0 : index
    %c0_10 = arith.constant 0 : index
    %12 = vector.load %arg5[%c0_9, %c0_10] : memref<1x512xf32, #tpu.memory_space<vmem>>, vector<1x512xf32>
    %13 = vector.broadcast %12 : vector<1x512xf32> to vector<16x512xf32>
    %14 = arith.addf %11, %13 : vector<16x512xf32>
    %cst_11 = arith.constant 0.000000e+00 : f32
    %15 = vector.broadcast %cst_11 : f32 to vector<16x512xf32>
    %16 = arith.maximumf %14, %15 : vector<16x512xf32>
    %17 = arith.truncf %16 : vector<16x512xf32> to vector<16x512xbf16>
    %c0_12 = arith.constant 0 : index
    %c0_13 = arith.constant 0 : index
    %18 = vector.load %arg6[%c0_12, %c0_13] : memref<512x128xbf16, #tpu.memory_space<vmem>>, vector<512x128xbf16>
    %cst_14 = arith.constant dense<0.000000e+00> : vector<16x128xf32>
    %19 = tpu.matmul %17, %18, %cst_14 {dimension_numbers = #tpu.dot_dimension_numbers<[1], [0], [0], [1], [0, 0, 1, 1], [], []>} : vector<16x512xbf16>, vector<512x128xbf16>, vector<16x128xf32> -> vector<16x128xf32>
    %c0_15 = arith.constant 0 : index
    %c0_16 = arith.constant 0 : index
    %20 = vector.load %arg7[%c0_15, %c0_16] : memref<1x128xf32, #tpu.memory_space<vmem>>, vector<1x128xf32>
    %21 = vector.broadcast %20 : vector<1x128xf32> to vector<16x128xf32>
    %22 = arith.addf %19, %21 : vector<16x128xf32>
    %c0_17 = arith.constant 0 : index
    %c0_18 = arith.constant 0 : index
    %23 = vector.load %arg8[%c0_17, %c0_18] : memref<16x128xf32, #tpu.memory_space<vmem>>, vector<16x128xf32>
    tpu.vector_store %arg8[%c0_17, %c0_18], %22 {strides = array<i32>} : memref<16x128xf32, #tpu.memory_space<vmem>>, vector<16x128xf32>,
    return
  }
  func.func @transform_0(%arg0: i32) -> (i32, i32) {
    %c0_i32 = arith.constant 0 : i32
    %c0_i32_0 = arith.constant 0 : i32
    return %arg0, %c0_i32 : i32, i32
  }
  func.func @transform_1(%arg0: i32) -> (i32, i32) {
    %c0_i32 = arith.constant 0 : i32
    %c0_i32_0 = arith.constant 0 : i32
    %c0_i32_1 = arith.constant 0 : i32
    return %c0_i32, %c0_i32_0 : i32, i32
  }
  func.func @transform_2(%arg0: i32) -> (i32, i32) {
    %c0_i32 = arith.constant 0 : i32
    %c0_i32_0 = arith.constant 0 : i32
    %c0_i32_1 = arith.constant 0 : i32
    return %c0_i32, %c0_i32_0 : i32, i32
  }
  func.func @transform_3(%arg0: i32) -> (i32, i32) {
    %c0_i32 = arith.constant 0 : i32
    %c0_i32_0 = arith.constant 0 : i32
    %c0_i32_1 = arith.constant 0 : i32
    return %c0_i32, %c0_i32_0 : i32, i32
  }
  func.func @transform_4(%arg0: i32) -> (i32, i32) {
    %c0_i32 = arith.constant 0 : i32
    %c0_i32_0 = arith.constant 0 : i32
    %c0_i32_1 = arith.constant 0 : i32
    return %c0_i32, %c0_i32_0 : i32, i32
  }
  func.func @transform_5(%arg0: i32) -> (i32, i32) {
    %c0_i32 = arith.constant 0 : i32
    %c0_i32_0 = arith.constant 0 : i32
    %c0_i32_1 = arith.constant 0 : i32
    return %c0_i32, %c0_i32_0 : i32, i32
  }
  func.func @transform_6(%arg0: i32) -> (i32, i32) {
    %c0_i32 = arith.constant 0 : i32
    %c0_i32_0 = arith.constant 0 : i32
    %c0_i32_1 = arith.constant 0 : i32
    return %c0_i32, %c0_i32_0 : i32, i32
  }
  func.func @transform_7(%arg0: i32) -> (i32, i32) {
    %c0_i32 = arith.constant 0 : i32
    %c0_i32_0 = arith.constant 0 : i32
    return %arg0, %c0_i32 : i32, i32
  }
}

</mosaic_0001>

<bundles_post_ra>
// kernel: neural_network_forward.1
= control target key start
LH: loop header
LB: loop body
LE: loop exit
PB: predicated region body
PF: predicated region fallthrough
CT: control target
= control target key end

     0   :  { %12 = vsyncpa [#allocation3], 0  ;;  %s4282_s0 = inlined_call_operand.vmem [shape: f32[8,784], index: 0, kind: input, shape index: {}]   ;;  %s4283_s1 = inlined_call_operand.hbm [shape: bf16[784,512], index: 1, kind: input, shape index: {}]   ;;  %s4284_s2 = inlined_call_operand.vmem [shape: f32[1,512], index: 2, kind: input, shape index: {}]   ;;  %s4285_s3 = inlined_call_operand.hbm [shape: bf16[512,512], index: 3, kind: input, shape index: {}]   ;;  %s4286_s4 = inlined_call_operand.vmem [shape: f32[1,512], index: 4, kind: input, shape index: {}]   ;;  %s4287_s5 = inlined_call_operand.vmem [shape: bf16[512,128], index: 5, kind: input, shape index: {}]   ;;  %s4288_s6 = inlined_call_operand.vmem [shape: f32[1,128], index: 6, kind: input, shape index: {}]   ;;  %s4289_s7 = inlined_call_operand.hbm [shape: f32[8,128], index: 7, kind: output, shape index: {}]  }
   0x1   :  { %13 = vsyncpa [#allocation6], 0 }
   0x2   :  { %14 = vsyncpa [#allocation4], 0  ;;  %s4023_s24 = smov [#allocation2]   ;;  %s3951_s28 = scalar_lea.hbm %s4283_s1, 25088 }
   0x3   :  { %s22_s25 = sshll.u32 %s4023_s24, 4  ;;  %p3952_p0 = scmp.ne.s32.totalorder %s4283_s1, %s3951_s28  ;;  %s23_s25 = int_to_ptr.vmem [resolvable:$true] %s22_s25 }
   0x4   :  { %p3955_p1 = scmp.lt.u32.totalorder %s3951_s28, %s4283_s1 }
   0x6   :  { %p3957_p2 = pnand %p3955_p1, %p3952_p0 }
   0x8   :  { %3960 = shalt.err (!%p3957_p2)
}
   0x9   :  { %s3961_s10 = scalar_lea.vmem %s23_s25, 25088  ;;  %p3966_p4 = scmp.lt.s32.totalorder %s23_s25, %s23_s25 }
   0xa   :  { %p3962_p3 = scmp.ne.s32.totalorder %s23_s25, %s3961_s10  ;;  %p3967_p5 = scmp.lt.s32.totalorder %s3961_s10, %s3961_s10 }
   0xc   :  { %p3968_p6 = por %p3967_p5, %p3966_p4 }
   0xe   :  { %p3969_p7 = pnand %p3968_p6, %p3962_p3 }
  0x10   :  { %3972 = shalt.err (!%p3969_p7)
}
  0x11   :  { %s4024_s11 = smov 256   ;;  %s4025_s12 = smov 16  }
  0x12   :  { %28 = dma.hbm_to_vmem [thread:$0]  %s4283_s1, 25088, %s23_s25, [#allocation3], %s4024_s11, %s4024_s11, %s4025_s12  }
  0x13   :  { %s4026_s15 = smov [#allocation5]   ;;  %s3973_s19 = scalar_lea.hbm %s4285_s3, 16384 }
  0x14   :  { %s36_s16 = sshll.u32 %s4026_s15, 4  ;;  %p3974_p8 = scmp.ne.s32.totalorder %s4285_s3, %s3973_s19  ;;  %s37_s16 = int_to_ptr.vmem [resolvable:$true] %s36_s16 }
  0x15   :  { %p3977_p9 = scmp.lt.u32.totalorder %s3973_s19, %s4285_s3 }
  0x17   :  { %p3979_p10 = pnand %p3977_p9, %p3974_p8 }
  0x19   :  { %3982 = shalt.err (!%p3979_p10)
}
  0x1a   :  { %s3983_s24 = scalar_lea.vmem %s37_s16, 16384  ;;  %p3988_p12 = scmp.lt.s32.totalorder %s37_s16, %s37_s16 }
  0x1b   :  { %p3984_p11 = scmp.ne.s32.totalorder %s37_s16, %s3983_s24  ;;  %p3989_p13 = scmp.lt.s32.totalorder %s3983_s24, %s3983_s24 }
  0x1d   :  { %p3990_p0 = por %p3989_p13, %p3988_p12 }
  0x1f   :  { %p3991_p1 = pnand %p3990_p0, %p3984_p11 }
  0x21   :  { %3994 = shalt.err (!%p3991_p1)
}
  0x22   :  { %42 = dma.hbm_to_vmem [thread:$0]  %s4285_s3, 16384, %s37_s16, [#allocation6], %s4024_s11, %s4024_s11, %s4025_s12  }
  0x23   :  { %4017 = dma.done.wait [#allocation3], 25088  }
  0x24   :  { %4018 = vsyncadd [#allocation3], 4294942208 }
  0x25   :  { %4019 = dma.done.wait [#allocation6], 16384  }
  0x26   :  { %4020 = vsyncadd [#allocation6], 4294950912  ;;  %v3433_v0 = vld [vmem:[#allocation2 + $0x4] ss:$16 sps:$4 sm:$0xff]   ;;  %v3435_v1 = vld [vmem:[#allocation2 + $0xc] ss:$16 sps:$4 sm:$0xff]  }
  0x27   :  { %1279 = vmatprep.subr.bf16.mxu0 %v3433_v0  ;;  %v3437_v2 = vld [vmem:[#allocation2] ss:$16 sps:$4 sm:$0xff]   ;;  %v3438_v3 = vld [vmem:[#allocation2 + $0x8] ss:$16 sps:$4 sm:$0xff]   ;;  %1451 = vmatprep.subr.bf16.mxu1 %v3435_v1  ;;  %v3439_v4 = vld [vmem:[#allocation2 + $0x24] ss:$16 sps:$4 sm:$0xff]  }
  0x28   :  { %1280 = vmatpush1.bf16.msra.mxu0 %v3437_v2  ;;  %1452 = vmatpush1.bf16.msra.mxu1 %v3438_v3  ;;  %v3441_v5 = vld [vmem:[#allocation2 + $0x2c] ss:$16 sps:$4 sm:$0xff]   ;;  %v3443_v6 = vld [vmem:[#allocation2 + $0x20] ss:$16 sps:$4 sm:$0xff]   ;;  %v3444_v7 = vld [vmem:[#allocation2 + $0x28] ss:$16 sps:$4 sm:$0xff]  }
  0x29   :  { %1281 = vmatprep.subr.bf16.mxu0 %v3439_v4  ;;  %1453 = vmatprep.subr.bf16.mxu1 %v3441_v5  ;;  %v3445_v8 = vld [vmem:[#allocation2 + $0x44] ss:$16 sps:$4 sm:$0xff]   ;;  %v3447_v9 = vld [vmem:[#allocation2 + $0x4c] ss:$16 sps:$4 sm:$0xff]   ;;  %v3449_v10 = vld [vmem:[#allocation2 + $0x40] ss:$16 sps:$4 sm:$0xff]  }
  0x2a   :  { %v3450_v11 = vld [vmem:[#allocation2 + $0x48] ss:$16 sps:$4 sm:$0xff]   ;;  %v3451_v12 = vld [vmem:[#allocation2 + $0x64] ss:$16 sps:$4 sm:$0xff]   ;;  %v3453_v13 = vld [vmem:[#allocation2 + $0x6c] ss:$16 sps:$4 sm:$0xff]  }
  0x2b   :  { %v3455_v14 = vld [vmem:[#allocation2 + $0x60] ss:$16 sps:$4 sm:$0xff]   ;;  %v3456_v15 = vld [vmem:[#allocation2 + $0x68] ss:$16 sps:$4 sm:$0xff]   ;;  %v3457_v16 = vld [vmem:[#allocation2 + $0x84] ss:$16 sps:$4 sm:$0xff]  }
  0x2c   :  { %1282 = vmatpush1.bf16.msra.mxu0 %v3443_v6  ;;  %1454 = vmatpush1.bf16.msra.mxu1 %v3444_v7  ;;  %v3459_v17 = vld [vmem:[#allocation2 + $0x8c] ss:$16 sps:$4 sm:$0xff]   ;;  %v3461_v18 = vld [vmem:[#allocation2 + $0x80] ss:$16 sps:$4 sm:$0xff]   ;;  %v3462_v19 = vld [vmem:[#allocation2 + $0x88] ss:$16 sps:$4 sm:$0xff]  }
  0x2d   :  { %1283 = vmatprep.subr.bf16.mxu0 %v3445_v8  ;;  %1455 = vmatprep.subr.bf16.mxu1 %v3447_v9  ;;  %v3463_v20 = vld [vmem:[#allocation2 + $0xa4] ss:$16 sps:$4 sm:$0xff]   ;;  %v3465_v21 = vld [vmem:[#allocation2 + $0xac] ss:$16 sps:$4 sm:$0xff]   ;;  %v3467_v22 = vld [vmem:[#allocation2 + $0xa0] ss:$16 sps:$4 sm:$0xff]  }
  0x2e   :  { %v3468_v23 = vld [vmem:[#allocation2 + $0xa8] ss:$16 sps:$4 sm:$0xff]   ;;  %v3469_v24 = vld [vmem:[#allocation2 + $0xc4] ss:$16 sps:$4 sm:$0xff]   ;;  %v3471_v25 = vld [vmem:[#allocation2 + $0xcc] ss:$16 sps:$4 sm:$0xff]  }
  0x2f   :  { %v3473_v26 = vld [vmem:[#allocation2 + $0xc0] ss:$16 sps:$4 sm:$0xff]   ;;  %v3474_v27 = vld [vmem:[#allocation2 + $0xc8] ss:$16 sps:$4 sm:$0xff]   ;;  %v3475_v28 = vld [vmem:[#allocation2 + $0xe4] ss:$16 sps:$4 sm:$0xff]  }
  0x30   :  { %1284 = vmatpush1.bf16.msra.mxu0 %v3449_v10  ;;  %1456 = vmatpush1.bf16.msra.mxu1 %v3450_v11  ;;  %v3477_v29 = vld [vmem:[#allocation2 + $0xec] ss:$16 sps:$4 sm:$0xff]   ;;  %v3479_v30 = vld [vmem:[#allocation2 + $0xe0] ss:$16 sps:$4 sm:$0xff]   ;;  %v3480_v31 = vld [vmem:[#allocation2 + $0xe8] ss:$16 sps:$4 sm:$0xff]  }
  0x31   :  { %1285 = vmatprep.subr.bf16.mxu0 %v3451_v12  ;;  %1457 = vmatprep.subr.bf16.mxu1 %v3453_v13  ;;  %v3481_v32 = vld [vmem:[#allocation2 + $0x104] ss:$16 sps:$4 sm:$0xff]   ;;  %v3483_v33 = vld [vmem:[#allocation2 + $0x10c] ss:$16 sps:$4 sm:$0xff]   ;;  %v3485_v34 = vld [vmem:[#allocation2 + $0x100] ss:$16 sps:$4 sm:$0xff]  }
  0x32   :  { %v3486_v35 = vld [vmem:[#allocation2 + $0x108] ss:$16 sps:$4 sm:$0xff]   ;;  %v3487_v36 = vld [vmem:[#allocation2 + $0x124] ss:$16 sps:$4 sm:$0xff]   ;;  %v3489_v37 = vld [vmem:[#allocation2 + $0x12c] ss:$16 sps:$4 sm:$0xff]  }
  0x33   :  { %v3491_v38 = vld [vmem:[#allocation2 + $0x120] ss:$16 sps:$4 sm:$0xff]   ;;  %v3492_v39 = vld [vmem:[#allocation2 + $0x128] ss:$16 sps:$4 sm:$0xff]   ;;  %v3493_v40 = vld [vmem:[#allocation2 + $0x144] ss:$16 sps:$4 sm:$0xff]  }
  0x34   :  { %1286 = vmatpush1.bf16.msra.mxu0 %v3455_v14  ;;  %1458 = vmatpush1.bf16.msra.mxu1 %v3456_v15  ;;  %v3495_v41 = vld [vmem:[#allocation2 + $0x14c] ss:$16 sps:$4 sm:$0xff]   ;;  %v3497_v42 = vld [vmem:[#allocation2 + $0x140] ss:$16 sps:$4 sm:$0xff]   ;;  %v3498_v43 = vld [vmem:[#allocation2 + $0x148] ss:$16 sps:$4 sm:$0xff]  }
  0x35   :  { %1287 = vmatprep.subr.bf16.mxu0 %v3457_v16  ;;  %1459 = vmatprep.subr.bf16.mxu1 %v3459_v17  ;;  %v3499_v44 = vld [vmem:[#allocation2 + $0x164] ss:$16 sps:$4 sm:$0xff]   ;;  %v3501_v45 = vld [vmem:[#allocation2 + $0x16c] ss:$16 sps:$4 sm:$0xff]   ;;  %v3503_v48 = vld [vmem:[#allocation2 + $0x160] ss:$16 sps:$4 sm:$0xff]  }
  0x36   :  { %v57_v46 = vld [vmem:[%s4282_s0 + $0x8] sm:$0xff]  ;;  %v64_v47 = vld [vmem:[%s4282_s0 + $0x40] sm:$0xff]  ;;  %v63_v5 = vld [vmem:[%s4282_s0 + $0x38] sm:$0xff]  ;;  %vm1275_vm0 = vcmask 130048  }
  0x37   :  { %v3504_v49 = vld [vmem:[#allocation2 + $0x168] ss:$16 sps:$4 sm:$0xff]   ;;  %v71_v50 = vpack.c.bf16 %v64_v47, %v57_v46  ;;  %v3505_v51 = vld [vmem:[#allocation2 + $0x184] ss:$16 sps:$4 sm:$0xff]   ;;  %v3507_v52 = vld [vmem:[#allocation2 + $0x18c] ss:$16 sps:$4 sm:$0xff]  }
  0x38   :  { %1288 = vmatpush1.bf16.msra.mxu0 %v3461_v18  ;;  %1460 = vmatpush1.bf16.msra.mxu1 %v3462_v19  ;;  %v3509_v53 = vld [vmem:[#allocation2 + $0x180] ss:$16 sps:$4 sm:$0xff]   ;;  %v3510_v54 = vld [vmem:[#allocation2 + $0x188] ss:$16 sps:$4 sm:$0xff]   ;;  %v3511_v55 = vld [vmem:[#allocation2 + $0x1a4] ss:$16 sps:$4 sm:$0xff]  }
  0x39   :  { %1289 = vmatprep.subr.bf16.mxu0 %v3463_v20  ;;  %1461 = vmatprep.subr.bf16.mxu1 %v3465_v21  ;;  %v3513_v56 = vld [vmem:[#allocation2 + $0x1ac] ss:$16 sps:$4 sm:$0xff]   ;;  %v3515_v57 = vld [vmem:[#allocation2 + $0x1a0] ss:$16 sps:$4 sm:$0xff]   ;;  %v3516_v58 = vld [vmem:[#allocation2 + $0x1a8] ss:$16 sps:$4 sm:$0xff]  }
  0x3a   :  { %1311 = vmatprep.mubr.bf16.mxu0 %v71_v50  ;;  %1483 = vmatprep.mubr.bf16.mxu1 %v71_v50  ;;  %v3517_v59 = vld [vmem:[#allocation2 + $0x1c4] ss:$16 sps:$4 sm:$0xff]   ;;  %v3519_v60 = vld [vmem:[#allocation2 + $0x1cc] ss:$16 sps:$4 sm:$0xff]   ;;  %v3521_v61 = vld [vmem:[#allocation2 + $0x1c0] ss:$16 sps:$4 sm:$0xff]  }
  0x3b   :  { %v3522_v62 = vld [vmem:[#allocation2 + $0x1c8] ss:$16 sps:$4 sm:$0xff]   ;;  %v3523_v63 = vld [vmem:[#allocation2 + $0x1e4] ss:$16 sps:$4 sm:$0xff]   ;;  %v3525_v0 = vld [vmem:[#allocation2 + $0x1ec] ss:$16 sps:$4 sm:$0xff]  }
  0x3c   :  { %1290 = vmatpush1.bf16.msra.mxu0 %v3467_v22  ;;  %1462 = vmatpush1.bf16.msra.mxu1 %v3468_v23  ;;  %v3527_v1 = vld [vmem:[#allocation2 + $0x1e0] ss:$16 sps:$4 sm:$0xff]   ;;  %v3528_v2 = vld [vmem:[#allocation2 + $0x1e8] ss:$16 sps:$4 sm:$0xff]   ;;  %v3531_v3 = vld [vmem:[#allocation2 + $0x204] ss:$16 sps:$4 sm:$0xff]  }
  0x3d   :  { %1291 = vmatprep.subr.bf16.mxu0 %v3469_v24  ;;  %1463 = vmatprep.subr.bf16.mxu1 %v3471_v25  ;;  %v56_v4 = vld [vmem:[%s4282_s0] sm:$0xff]  ;;  %v3534_v6 = vld [vmem:[#allocation2 + $0x20c] ss:$16 sps:$4 sm:$0xff]   ;;  %v3532_v8 = vld [vmem:[#allocation2 + $0x208] ss:$16 sps:$4 sm:$0xff]  }
  0x3e   :  { %v3529_v7 = vld [vmem:[#allocation2 + $0x200] ss:$16 sps:$4 sm:$0xff]   ;;  %v70_v9 = vpack.c.bf16 %v63_v5, %v56_v4  ;;  %v3537_v10 = vld [vmem:[#allocation2 + $0x224] ss:$16 sps:$4 sm:$0xff]   ;;  %v3540_v11 = vld [vmem:[#allocation2 + $0x22c] ss:$16 sps:$4 sm:$0xff]  }
  0x3f   :  { %v3535_v12 = vld [vmem:[#allocation2 + $0x220] ss:$16 sps:$4 sm:$0xff]   ;;  %v3538_v13 = vld [vmem:[#allocation2 + $0x228] ss:$16 sps:$4 sm:$0xff]   ;;  %v3543_v14 = vld [vmem:[#allocation2 + $0x244] ss:$16 sps:$4 sm:$0xff]  }
  0x40   :  { %1292 = vmatpush1.bf16.msra.mxu0 %v3473_v26  ;;  %1464 = vmatpush1.bf16.msra.mxu1 %v3474_v27  ;;  %v3546_v15 = vld [vmem:[#allocation2 + $0x24c] ss:$16 sps:$4 sm:$0xff]   ;;  %v3541_v16 = vld [vmem:[#allocation2 + $0x240] ss:$16 sps:$4 sm:$0xff]   ;;  %v3544_v17 = vld [vmem:[#allocation2 + $0x248] ss:$16 sps:$4 sm:$0xff]  }
  0x41   :  { %1293 = vmatprep.subr.bf16.mxu0 %v3475_v28  ;;  %1465 = vmatprep.subr.bf16.mxu1 %v3477_v29  ;;  %v3549_v18 = vld [vmem:[#allocation2 + $0x264] ss:$16 sps:$4 sm:$0xff]   ;;  %v3552_v19 = vld [vmem:[#allocation2 + $0x26c] ss:$16 sps:$4 sm:$0xff]   ;;  %v3547_v20 = vld [vmem:[#allocation2 + $0x260] ss:$16 sps:$4 sm:$0xff]  }
  0x42   :  { %v3550_v21 = vld [vmem:[#allocation2 + $0x268] ss:$16 sps:$4 sm:$0xff]   ;;  %v3555_v22 = vld [vmem:[#allocation2 + $0x284] ss:$16 sps:$4 sm:$0xff]   ;;  %v3558_v23 = vld [vmem:[#allocation2 + $0x28c] ss:$16 sps:$4 sm:$0xff]  }
  0x43   :  { %v3553_v24 = vld [vmem:[#allocation2 + $0x280] ss:$16 sps:$4 sm:$0xff]   ;;  %v3556_v25 = vld [vmem:[#allocation2 + $0x288] ss:$16 sps:$4 sm:$0xff]   ;;  %v3561_v26 = vld [vmem:[#allocation2 + $0x2a4] ss:$16 sps:$4 sm:$0xff]  }
  0x44   :  { %1294 = vmatpush1.bf16.msra.mxu0 %v3479_v30  ;;  %1466 = vmatpush1.bf16.msra.mxu1 %v3480_v31  ;;  %v3564_v27 = vld [vmem:[#allocation2 + $0x2ac] ss:$16 sps:$4 sm:$0xff]   ;;  %v3559_v28 = vld [vmem:[#allocation2 + $0x2a0] ss:$16 sps:$4 sm:$0xff]   ;;  %v3562_v29 = vld [vmem:[#allocation2 + $0x2a8] ss:$16 sps:$4 sm:$0xff]  }
  0x45   :  { %1295 = vmatprep.subr.bf16.mxu0 %v3481_v32  ;;  %1467 = vmatprep.subr.bf16.mxu1 %v3483_v33  ;;  %v3567_v30 = vld [vmem:[#allocation2 + $0x2c4] ss:$16 sps:$4 sm:$0xff]   ;;  %v3570_v31 = vld [vmem:[#allocation2 + $0x2cc] ss:$16 sps:$4 sm:$0xff]   ;;  %v3583_v47 = vld [vmem:[#allocation2 + $0x320] ss:$16 sps:$4 sm:$0xff]  }
  0x46   :  { %v59_v32 = vld [vmem:[%s4282_s0 + $0x18] sm:$0xff]  ;;  %v66_v33 = vld [vmem:[%s4282_s0 + $0x50] sm:$0xff] }
  0x47   :  { %v3588_v46 = vld [vmem:[#allocation2 + $0x32c] ss:$16 sps:$4 sm:$0xff]   ;;  %v3616_v4 = vld [vmem:[#allocation2 + $0x3c8] ss:$16 sps:$4 sm:$0xff]   ;;  %v3621_v5 = vld [vmem:[#allocation2 + $0x3e4] ss:$16 sps:$4 sm:$0xff]  }
  0x48   :  { %1296 = vmatpush1.bf16.msra.mxu0 %v3485_v34  ;;  %1468 = vmatpush1.bf16.msra.mxu1 %v3486_v35  ;;  %v3565_v34 = vld [vmem:[#allocation2 + $0x2c0] ss:$16 sps:$4 sm:$0xff]   ;;  %v3568_v35 = vld [vmem:[#allocation2 + $0x2c8] ss:$16 sps:$4 sm:$0xff]   ;;  %v3594_v50 = vld [vmem:[#allocation2 + $0x34c] ss:$16 sps:$4 sm:$0xff]  }
  0x49   :  { %1297 = vmatprep.subr.bf16.mxu0 %v3487_v36  ;;  %1469 = vmatprep.subr.bf16.mxu1 %v3489_v37  ;;  %v73_v36 = vpack.c.bf16 %v66_v33, %v59_v32  ;;  %v3573_v37 = vld [vmem:[#allocation2 + $0x2e4] ss:$16 sps:$4 sm:$0xff]   ;;  %v3654_v32 = vld [vmem:[#allocation2 + $0x48c] ss:$16 sps:$4 sm:$0xff]   ;;  %v3649_v33 = vld [vmem:[#allocation2 + $0x480] ss:$16 sps:$4 sm:$0xff]  }
  0x4c   :  { %1298 = vmatpush1.bf16.msra.mxu0 %v3491_v38  ;;  %1470 = vmatpush1.bf16.msra.mxu1 %v3492_v39  ;;  %v3576_v38 = vld [vmem:[#allocation2 + $0x2ec] ss:$16 sps:$4 sm:$0xff]   ;;  %v3571_v39 = vld [vmem:[#allocation2 + $0x2e0] ss:$16 sps:$4 sm:$0xff]  }
  0x4d   :  { %1299 = vmatprep.subr.bf16.mxu0 %v3493_v40  ;;  %1471 = vmatprep.subr.bf16.mxu1 %v3495_v41  ;;  %v3574_v40 = vld [vmem:[#allocation2 + $0x2e8] ss:$16 sps:$4 sm:$0xff]   ;;  %v3579_v41 = vld [vmem:[#allocation2 + $0x304] ss:$16 sps:$4 sm:$0xff]  }
  0x50   :  { %1300 = vmatpush1.bf16.msra.mxu0 %v3497_v42  ;;  %1472 = vmatpush1.bf16.msra.mxu1 %v3498_v43  ;;  %v3582_v42 = vld [vmem:[#allocation2 + $0x30c] ss:$16 sps:$4 sm:$0xff]   ;;  %v3577_v43 = vld [vmem:[#allocation2 + $0x300] ss:$16 sps:$4 sm:$0xff]  }
  0x51   :  { %1301 = vmatprep.subr.bf16.mxu0 %v3499_v44  ;;  %1473 = vmatprep.subr.bf16.mxu1 %v3501_v45  ;;  %v3580_v44 = vld [vmem:[#allocation2 + $0x308] ss:$16 sps:$4 sm:$0xff]   ;;  %v3585_v45 = vld [vmem:[#allocation2 + $0x324] ss:$16 sps:$4 sm:$0xff]  }
  0x54   :  { %1302 = vmatpush1.bf16.msra.mxu0 %v3503_v48  ;;  %1474 = vmatpush1.bf16.msra.mxu1 %v3504_v49  ;;  %v3586_v48 = vld [vmem:[#allocation2 + $0x328] ss:$16 sps:$4 sm:$0xff]   ;;  %v3591_v49 = vld [vmem:[#allocation2 + $0x344] ss:$16 sps:$4 sm:$0xff]  }
  0x55   :  { %1303 = vmatprep.subr.bf16.mxu0 %v3505_v51  ;;  %1475 = vmatprep.subr.bf16.mxu1 %v3507_v52  ;;  %v3589_v51 = vld [vmem:[#allocation2 + $0x340] ss:$16 sps:$4 sm:$0xff]   ;;  %v3592_v52 = vld [vmem:[#allocation2 + $0x348] ss:$16 sps:$4 sm:$0xff]  }
  0x58   :  { %1304 = vmatpush1.bf16.msra.mxu0 %v3509_v53  ;;  %1476 = vmatpush1.bf16.msra.mxu1 %v3510_v54  ;;  %v3597_v53 = vld [vmem:[#allocation2 + $0x364] ss:$16 sps:$4 sm:$0xff]   ;;  %v3600_v54 = vld [vmem:[#allocation2 + $0x36c] ss:$16 sps:$4 sm:$0xff]  }
  0x59   :  { %1305 = vmatprep.subr.bf16.mxu0 %v3511_v55  ;;  %1477 = vmatprep.subr.bf16.mxu1 %v3513_v56  ;;  %v3595_v55 = vld [vmem:[#allocation2 + $0x360] ss:$16 sps:$4 sm:$0xff]   ;;  %v3598_v56 = vld [vmem:[#allocation2 + $0x368] ss:$16 sps:$4 sm:$0xff]  }
  0x5c   :  { %1306 = vmatpush1.bf16.msra.mxu0 %v3515_v57  ;;  %1478 = vmatpush1.bf16.msra.mxu1 %v3516_v58  ;;  %v3603_v57 = vld [vmem:[#allocation2 + $0x384] ss:$16 sps:$4 sm:$0xff]   ;;  %v3606_v58 = vld [vmem:[#allocation2 + $0x38c] ss:$16 sps:$4 sm:$0xff]  }
  0x5d   :  { %1307 = vmatprep.subr.bf16.mxu0 %v3517_v59  ;;  %1479 = vmatprep.subr.bf16.mxu1 %v3519_v60  ;;  %v3601_v59 = vld [vmem:[#allocation2 + $0x380] ss:$16 sps:$4 sm:$0xff]   ;;  %v3604_v60 = vld [vmem:[#allocation2 + $0x388] ss:$16 sps:$4 sm:$0xff]  }
  0x60   :  { %1308 = vmatpush1.bf16.msra.mxu0 %v3521_v61  ;;  %1480 = vmatpush1.bf16.msra.mxu1 %v3522_v62  ;;  %v3609_v61 = vld [vmem:[#allocation2 + $0x3a4] ss:$16 sps:$4 sm:$0xff]   ;;  %v3612_v62 = vld [vmem:[#allocation2 + $0x3ac] ss:$16 sps:$4 sm:$0xff]  }
  0x61   :  { %1309 = vmatprep.subr.bf16.mxu0 %v3523_v63  ;;  %1481 = vmatprep.subr.bf16.mxu1 %v3525_v0  ;;  %v3607_v63 = vld [vmem:[#allocation2 + $0x3a0] ss:$16 sps:$4 sm:$0xff]   ;;  %v3610_v0 = vld [vmem:[#allocation2 + $0x3a8] ss:$16 sps:$4 sm:$0xff]  }
  0x64   :  { %1310 = vmatpush1.bf16.msra.mxu0 %v3527_v1  ;;  %1482 = vmatpush1.bf16.msra.mxu1 %v3528_v2  ;;  %v3615_v1 = vld [vmem:[#allocation2 + $0x3c4] ss:$16 sps:$4 sm:$0xff]   ;;  %v3618_v2 = vld [vmem:[#allocation2 + $0x3cc] ss:$16 sps:$4 sm:$0xff]  }
  0x65   :  { %1322 = vmatprep.subr.bf16.mxu0 %v3531_v3  ;;  %1494 = vmatprep.subr.bf16.mxu1 %v3534_v6  ;;  %v3613_v3 = vld [vmem:[#allocation2 + $0x3c0] ss:$16 sps:$4 sm:$0xff]   ;;  %v3624_v6 = vld [vmem:[#allocation2 + $0x3ec] ss:$16 sps:$4 sm:$0xff]  }
  0x67   :  { %1312 = vmatmul.mubr.bf16.vlgmr.msra.gmra.mrb[0].mxu0 %v70_v9  ;;  %1484 = vmatmul.mubr.bf16.vlgmr.msra.gmra.mrb[0].mxu1 %v70_v9  ;;  %v3627_v9 = vld [vmem:[#allocation2 + $0x404] ss:$16 sps:$4 sm:$0xff]  }
  0x68   :  { %1323 = vmatpush1.bf16.msra.mxu0 %v3529_v7  ;;  %1495 = vmatpush1.bf16.msra.mxu1 %v3532_v8  ;;  %v3619_v7 = vld [vmem:[#allocation2 + $0x3e0] ss:$16 sps:$4 sm:$0xff]   ;;  %v3622_v8 = vld [vmem:[#allocation2 + $0x3e8] ss:$16 sps:$4 sm:$0xff]  }
  0x69   :  { %1324 = vmatprep.subr.bf16.mxu0 %v3537_v10  ;;  %1496 = vmatprep.subr.bf16.mxu1 %v3540_v11  ;;  %v58_v10 = vld [vmem:[%s4282_s0 + $0x10] sm:$0xff]  ;;  %v65_v11 = vld [vmem:[%s4282_s0 + $0x48] sm:$0xff] }
  0x6a   :  { %1354 = vmatprep.mubr.bf16.mxu0 %v73_v36  ;;  %1526 = vmatprep.mubr.bf16.mxu1 %v73_v36  ;;  %v3660_v36 = vld [vmem:[#allocation2 + $0x4ac] ss:$16 sps:$4 sm:$0xff]  }
  0x6c   :  { %1325 = vmatpush1.bf16.msra.mxu0 %v3535_v12  ;;  %1497 = vmatpush1.bf16.msra.mxu1 %v3538_v13  ;;  %v3630_v12 = vld [vmem:[#allocation2 + $0x40c] ss:$16 sps:$4 sm:$0xff]   ;;  %v3625_v13 = vld [vmem:[#allocation2 + $0x400] ss:$16 sps:$4 sm:$0xff]  }
  0x6d   :  { %1326 = vmatprep.subr.bf16.mxu0 %v3543_v14  ;;  %1498 = vmatprep.subr.bf16.mxu1 %v3546_v15  ;;  %v3628_v14 = vld [vmem:[#allocation2 + $0x408] ss:$16 sps:$4 sm:$0xff]   ;;  %v72_v15 = vpack.c.bf16 %v65_v11, %v58_v10  ;;  %v3717_v11 = vld [vmem:[#allocation2 + $0x5e4] ss:$16 sps:$4 sm:$0xff]  }
  0x6e   :  { %v3712_v10 = vld [vmem:[#allocation2 + $0x5c8] ss:$16 sps:$4 sm:$0xff]  }
  0x70   :  { %1327 = vmatpush1.bf16.msra.mxu0 %v3541_v16  ;;  %1499 = vmatpush1.bf16.msra.mxu1 %v3544_v17  ;;  %v3633_v16 = vld [vmem:[#allocation2 + $0x424] ss:$16 sps:$4 sm:$0xff]   ;;  %v3636_v17 = vld [vmem:[#allocation2 + $0x42c] ss:$16 sps:$4 sm:$0xff]  }
  0x71   :  { %1328 = vmatprep.subr.bf16.mxu0 %v3549_v18  ;;  %1500 = vmatprep.subr.bf16.mxu1 %v3552_v19  ;;  %v61_v18 = vld [vmem:[%s4282_s0 + $0x28] sm:$0xff]  ;;  %v3631_v19 = vld [vmem:[#allocation2 + $0x420] ss:$16 sps:$4 sm:$0xff]  }
  0x74   :  { %1329 = vmatpush1.bf16.msra.mxu0 %v3547_v20  ;;  %1501 = vmatpush1.bf16.msra.mxu1 %v3550_v21  ;;  %v3634_v20 = vld [vmem:[#allocation2 + $0x428] ss:$16 sps:$4 sm:$0xff]   ;;  %v68_v21 = vld [vmem:[%s4282_s0 + $0x60] sm:$0xff] }
  0x75   :  { %1330 = vmatprep.subr.bf16.mxu0 %v3555_v22  ;;  %1502 = vmatprep.subr.bf16.mxu1 %v3558_v23  ;;  %v3639_v22 = vld [vmem:[#allocation2 + $0x444] ss:$16 sps:$4 sm:$0xff]   ;;  %v75_v23 = vpack.c.bf16 %v68_v21, %v61_v18  ;;  %v3726_v18 = vld [vmem:[#allocation2 + $0x60c] ss:$16 sps:$4 sm:$0xff]  }
  0x78   :  { %1331 = vmatpush1.bf16.msra.mxu0 %v3553_v24  ;;  %1503 = vmatpush1.bf16.msra.mxu1 %v3556_v25  ;;  %v3642_v24 = vld [vmem:[#allocation2 + $0x44c] ss:$16 sps:$4 sm:$0xff]   ;;  %v3637_v25 = vld [vmem:[#allocation2 + $0x440] ss:$16 sps:$4 sm:$0xff]  }
  0x79   :  { %1332 = vmatprep.subr.bf16.mxu0 %v3561_v26  ;;  %1504 = vmatprep.subr.bf16.mxu1 %v3564_v27  ;;  %v3640_v26 = vld [vmem:[#allocation2 + $0x448] ss:$16 sps:$4 sm:$0xff]   ;;  %v3645_v27 = vld [vmem:[#allocation2 + $0x464] ss:$16 sps:$4 sm:$0xff]  }
  0x7c   :  { %1333 = vmatpush1.bf16.msra.mxu0 %v3559_v28  ;;  %1505 = vmatpush1.bf16.msra.mxu1 %v3562_v29  ;;  %v3648_v28 = vld [vmem:[#allocation2 + $0x46c] ss:$16 sps:$4 sm:$0xff]   ;;  %v3643_v29 = vld [vmem:[#allocation2 + $0x460] ss:$16 sps:$4 sm:$0xff]  }
  0x7d   :  { %1334 = vmatprep.subr.bf16.mxu0 %v3567_v30  ;;  %1506 = vmatprep.subr.bf16.mxu1 %v3570_v31  ;;  %v3646_v30 = vld [vmem:[#allocation2 + $0x468] ss:$16 sps:$4 sm:$0xff]   ;;  %v3651_v31 = vld [vmem:[#allocation2 + $0x484] ss:$16 sps:$4 sm:$0xff]  }
  0x80   :  { %1335 = vmatpush1.bf16.msra.mxu0 %v3565_v34  ;;  %1507 = vmatpush1.bf16.msra.mxu1 %v3568_v35  ;;  %v3652_v34 = vld [vmem:[#allocation2 + $0x488] ss:$16 sps:$4 sm:$0xff]   ;;  %v3657_v35 = vld [vmem:[#allocation2 + $0x4a4] ss:$16 sps:$4 sm:$0xff]  }
  0x81   :  { %1336 = vmatprep.subr.bf16.mxu0 %v3573_v37  ;;  %1508 = vmatprep.subr.bf16.mxu1 %v3576_v38  ;;  %v3655_v37 = vld [vmem:[#allocation2 + $0x4a0] ss:$16 sps:$4 sm:$0xff]   ;;  %v3658_v38 = vld [vmem:[#allocation2 + $0x4a8] ss:$16 sps:$4 sm:$0xff]  }
  0x84   :  { %1337 = vmatpush1.bf16.msra.mxu0 %v3571_v39  ;;  %1509 = vmatpush1.bf16.msra.mxu1 %v3574_v40  ;;  %v3663_v39 = vld [vmem:[#allocation2 + $0x4c4] ss:$16 sps:$4 sm:$0xff]   ;;  %v3666_v40 = vld [vmem:[#allocation2 + $0x4cc] ss:$16 sps:$4 sm:$0xff]  }
  0x85   :  { %1338 = vmatprep.subr.bf16.mxu0 %v3579_v41  ;;  %1510 = vmatprep.subr.bf16.mxu1 %v3582_v42  ;;  %v3661_v41 = vld [vmem:[#allocation2 + $0x4c0] ss:$16 sps:$4 sm:$0xff]   ;;  %v3664_v42 = vld [vmem:[#allocation2 + $0x4c8] ss:$16 sps:$4 sm:$0xff]  }
  0x88   :  { %1339 = vmatpush1.bf16.msra.mxu0 %v3577_v43  ;;  %1511 = vmatpush1.bf16.msra.mxu1 %v3580_v44  ;;  %v3669_v43 = vld [vmem:[#allocation2 + $0x4e4] ss:$16 sps:$4 sm:$0xff]   ;;  %v3672_v44 = vld [vmem:[#allocation2 + $0x4ec] ss:$16 sps:$4 sm:$0xff]  }
  0x89   :  { %1340 = vmatprep.subr.bf16.mxu0 %v3585_v45  ;;  %1512 = vmatprep.subr.bf16.mxu1 %v3588_v46  ;;  %v3667_v45 = vld [vmem:[#allocation2 + $0x4e0] ss:$16 sps:$4 sm:$0xff]   ;;  %v3670_v46 = vld [vmem:[#allocation2 + $0x4e8] ss:$16 sps:$4 sm:$0xff]  }
  0x8c   :  { %1341 = vmatpush1.bf16.msra.mxu0 %v3583_v47  ;;  %1513 = vmatpush1.bf16.msra.mxu1 %v3586_v48  ;;  %v3675_v47 = vld [vmem:[#allocation2 + $0x504] ss:$16 sps:$4 sm:$0xff]   ;;  %v3678_v48 = vld [vmem:[#allocation2 + $0x50c] ss:$16 sps:$4 sm:$0xff]  }
  0x8d   :  { %1342 = vmatprep.subr.bf16.mxu0 %v3591_v49  ;;  %1514 = vmatprep.subr.bf16.mxu1 %v3594_v50  ;;  %v3673_v49 = vld [vmem:[#allocation2 + $0x500] ss:$16 sps:$4 sm:$0xff]   ;;  %v3676_v50 = vld [vmem:[#allocation2 + $0x508] ss:$16 sps:$4 sm:$0xff]  }
  0x90   :  { %1343 = vmatpush1.bf16.msra.mxu0 %v3589_v51  ;;  %1515 = vmatpush1.bf16.msra.mxu1 %v3592_v52  ;;  %v3681_v51 = vld [vmem:[#allocation2 + $0x524] ss:$16 sps:$4 sm:$0xff]   ;;  %v3684_v52 = vld [vmem:[#allocation2 + $0x52c] ss:$16 sps:$4 sm:$0xff]  }
  0x91   :  { %1344 = vmatprep.subr.bf16.mxu0 %v3597_v53  ;;  %1516 = vmatprep.subr.bf16.mxu1 %v3600_v54  ;;  %v3679_v53 = vld [vmem:[#allocation2 + $0x520] ss:$16 sps:$4 sm:$0xff]   ;;  %v3682_v54 = vld [vmem:[#allocation2 + $0x528] ss:$16 sps:$4 sm:$0xff]  }
  0x94   :  { %1345 = vmatpush1.bf16.msra.mxu0 %v3595_v55  ;;  %1517 = vmatpush1.bf16.msra.mxu1 %v3598_v56  ;;  %v3687_v55 = vld [vmem:[#allocation2 + $0x544] ss:$16 sps:$4 sm:$0xff]   ;;  %v3690_v56 = vld [vmem:[#allocation2 + $0x54c] ss:$16 sps:$4 sm:$0xff]  }
  0x95   :  { %1346 = vmatprep.subr.bf16.mxu0 %v3603_v57  ;;  %1518 = vmatprep.subr.bf16.mxu1 %v3606_v58  ;;  %v3685_v57 = vld [vmem:[#allocation2 + $0x540] ss:$16 sps:$4 sm:$0xff]   ;;  %v3688_v58 = vld [vmem:[#allocation2 + $0x548] ss:$16 sps:$4 sm:$0xff]  }
  0x98   :  { %1347 = vmatpush1.bf16.msra.mxu0 %v3601_v59  ;;  %1519 = vmatpush1.bf16.msra.mxu1 %v3604_v60  ;;  %v3693_v59 = vld [vmem:[#allocation2 + $0x564] ss:$16 sps:$4 sm:$0xff]   ;;  %v3696_v60 = vld [vmem:[#allocation2 + $0x56c] ss:$16 sps:$4 sm:$0xff]  }
  0x99   :  { %1348 = vmatprep.subr.bf16.mxu0 %v3609_v61  ;;  %1520 = vmatprep.subr.bf16.mxu1 %v3612_v62  ;;  %v3691_v61 = vld [vmem:[#allocation2 + $0x560] ss:$16 sps:$4 sm:$0xff]   ;;  %v3694_v62 = vld [vmem:[#allocation2 + $0x568] ss:$16 sps:$4 sm:$0xff]  }
  0x9c   :  { %1349 = vmatpush1.bf16.msra.mxu0 %v3607_v63  ;;  %1521 = vmatpush1.bf16.msra.mxu1 %v3610_v0  ;;  %v3699_v63 = vld [vmem:[#allocation2 + $0x584] ss:$16 sps:$4 sm:$0xff]   ;;  %v3702_v0 = vld [vmem:[#allocation2 + $0x58c] ss:$16 sps:$4 sm:$0xff]  }
  0x9d   :  { %1350 = vmatprep.subr.bf16.mxu0 %v3615_v1  ;;  %1522 = vmatprep.subr.bf16.mxu1 %v3618_v2  ;;  %v3697_v1 = vld [vmem:[#allocation2 + $0x580] ss:$16 sps:$4 sm:$0xff]   ;;  %v3700_v2 = vld [vmem:[#allocation2 + $0x588] ss:$16 sps:$4 sm:$0xff]  }
  0xa0   :  { %1351 = vmatpush1.bf16.msra.mxu0 %v3613_v3  ;;  %1523 = vmatpush1.bf16.msra.mxu1 %v3616_v4  ;;  %v3705_v3 = vld [vmem:[#allocation2 + $0x5a4] ss:$16 sps:$4 sm:$0xff]   ;;  %v3708_v4 = vld [vmem:[#allocation2 + $0x5ac] ss:$16 sps:$4 sm:$0xff]  }
  0xa1   :  { %1352 = vmatprep.subr.bf16.mxu0 %v3621_v5  ;;  %1524 = vmatprep.subr.bf16.mxu1 %v3624_v6  ;;  %v3703_v5 = vld [vmem:[#allocation2 + $0x5a0] ss:$16 sps:$4 sm:$0xff]   ;;  %v3706_v6 = vld [vmem:[#allocation2 + $0x5a8] ss:$16 sps:$4 sm:$0xff]  }
  0xa4   :  { %1353 = vmatpush1.bf16.msra.mxu0 %v3619_v7  ;;  %1525 = vmatpush1.bf16.msra.mxu1 %v3622_v8  ;;  %v3711_v7 = vld [vmem:[#allocation2 + $0x5c4] ss:$16 sps:$4 sm:$0xff]   ;;  %v3714_v8 = vld [vmem:[#allocation2 + $0x5cc] ss:$16 sps:$4 sm:$0xff]  }
  0xa5   :  { %1365 = vmatprep.subr.bf16.mxu0 %v3627_v9  ;;  %1537 = vmatprep.subr.bf16.mxu1 %v3630_v12  ;;  %v3709_v9 = vld [vmem:[#allocation2 + $0x5c0] ss:$16 sps:$4 sm:$0xff]   ;;  %v3720_v12 = vld [vmem:[#allocation2 + $0x5ec] ss:$16 sps:$4 sm:$0xff]  }
  0xa7   :  { %1355 = vmatmul.mubr.bf16.vlgmr.msra.gmra.mrb[0].mxu0 %v72_v15  ;;  %1527 = vmatmul.mubr.bf16.vlgmr.msra.gmra.mrb[0].mxu1 %v72_v15  ;;  %v60_v15 = vld [vmem:[%s4282_s0 + $0x20] sm:$0xff] }
  0xa8   :  { %1366 = vmatpush1.bf16.msra.mxu0 %v3625_v13  ;;  %1538 = vmatpush1.bf16.msra.mxu1 %v3628_v14  ;;  %v3715_v13 = vld [vmem:[#allocation2 + $0x5e0] ss:$16 sps:$4 sm:$0xff]   ;;  %v3718_v14 = vld [vmem:[#allocation2 + $0x5e8] ss:$16 sps:$4 sm:$0xff]  }
  0xa9   :  { %1367 = vmatprep.subr.bf16.mxu0 %v3633_v16  ;;  %1539 = vmatprep.subr.bf16.mxu1 %v3636_v17  ;;  %v67_v16 = vld [vmem:[%s4282_s0 + $0x58] sm:$0xff]  ;;  %v3723_v17 = vld [vmem:[#allocation2 + $0x604] ss:$16 sps:$4 sm:$0xff]  }
  0xaa   :  { %1397 = vmatprep.mubr.bf16.mxu0 %v75_v23  ;;  %1569 = vmatprep.mubr.bf16.mxu1 %v75_v23  ;;  %v74_v21 = vpack.c.bf16 %v67_v16, %v60_v15  ;;  %v3732_v23 = vld [vmem:[#allocation5 + $0xc] ss:$16 sps:$4 sm:$0xff]   ;;  %v3805_v16 = vld [vmem:[#allocation5 + $0x1a0] ss:$16 sps:$4 sm:$0xff]  }
  0xab   :  { %v3810_v15 = vld [vmem:[#allocation5 + $0x1ac] ss:$16 sps:$4 sm:$0xff]  }
  0xac   :  { %1368 = vmatpush1.bf16.msra.mxu0 %v3631_v19  ;;  %1540 = vmatpush1.bf16.msra.mxu1 %v3634_v20  ;;  %v3721_v19 = vld [vmem:[#allocation2 + $0x600] ss:$16 sps:$4 sm:$0xff]   ;;  %v3724_v20 = vld [vmem:[#allocation2 + $0x608] ss:$16 sps:$4 sm:$0xff]  }
  0xad   :  { %1369 = vmatprep.subr.bf16.mxu0 %v3639_v22  ;;  %1541 = vmatprep.subr.bf16.mxu1 %v3642_v24  ;;  %v3729_v22 = vld [vmem:[#allocation5 + $0x4] ss:$16 sps:$4 sm:$0xff]   ;;  %v4027_v24 = vmov 0  }
  0xb0   :  { %1370 = vmatpush1.bf16.msra.mxu0 %v3637_v25  ;;  %1542 = vmatpush1.bf16.msra.mxu1 %v3640_v26  ;;  %v62_v25 = vld [vmem:[%s4282_s0 + $0x30] sm:$0xff]  ;;  %v69_v26 = vld [vmem:[%s4282_s0 + $0x68] sm:$0xff] }
  0xb1   :  { %1371 = vmatprep.subr.bf16.mxu0 %v3645_v27  ;;  %1543 = vmatprep.subr.bf16.mxu1 %v3648_v28  ;;  %v3727_v27 = vld [vmem:[#allocation5] ss:$16 sps:$4 sm:$0xff]   ;;  %v3730_v28 = vld [vmem:[#allocation5 + $0x8] ss:$16 sps:$4 sm:$0xff]  }
  0xb4   :  { %1372 = vmatpush1.bf16.msra.mxu0 %v3643_v29  ;;  %1544 = vmatpush1.bf16.msra.mxu1 %v3646_v30  ;;  %v76_v29 = vpack.c.bf16 %v69_v26, %v62_v25  ;;  %v3735_v30 = vld [vmem:[#allocation5 + $0x24] ss:$16 sps:$4 sm:$0xff]   ;;  %v3820_v25 = vld [vmem:[#allocation5 + $0x1e8] ss:$16 sps:$4 sm:$0xff]  }
  0xb5   :  { %1373 = vmatprep.subr.bf16.mxu0 %v3651_v31  ;;  %1545 = vmatprep.subr.bf16.mxu1 %v3654_v32  ;;  %v3738_v31 = vld [vmem:[#allocation5 + $0x2c] ss:$16 sps:$4 sm:$0xff]   ;;  %v3733_v32 = vld [vmem:[#allocation5 + $0x20] ss:$16 sps:$4 sm:$0xff]   ;;  %v3825_v26 = vld [vmem:[#allocation5 + $0x204] ss:$16 sps:$4 sm:$0xff]  }
  0xb8   :  { %1374 = vmatpush1.bf16.msra.mxu0 %v3649_v33  ;;  %1546 = vmatpush1.bf16.msra.mxu1 %v3652_v34  ;;  %v3736_v33 = vld [vmem:[#allocation5 + $0x28] ss:$16 sps:$4 sm:$0xff]   ;;  %v3741_v34 = vld [vmem:[#allocation5 + $0x44] ss:$16 sps:$4 sm:$0xff]  }
  0xb9   :  { %1375 = vmatprep.subr.bf16.mxu0 %v3657_v35  ;;  %1547 = vmatprep.subr.bf16.mxu1 %v3660_v36  ;;  %v3744_v35 = vld [vmem:[#allocation5 + $0x4c] ss:$16 sps:$4 sm:$0xff]   ;;  %v3739_v36 = vld [vmem:[#allocation5 + $0x40] ss:$16 sps:$4 sm:$0xff]  }
  0xbc   :  { %1376 = vmatpush1.bf16.msra.mxu0 %v3655_v37  ;;  %1548 = vmatpush1.bf16.msra.mxu1 %v3658_v38  ;;  %v3742_v37 = vld [vmem:[#allocation5 + $0x48] ss:$16 sps:$4 sm:$0xff]   ;;  %v3747_v38 = vld [vmem:[#allocation5 + $0x64] ss:$16 sps:$4 sm:$0xff]  }
  0xbd   :  { %1377 = vmatprep.subr.bf16.mxu0 %v3663_v39  ;;  %1549 = vmatprep.subr.bf16.mxu1 %v3666_v40  ;;  %v3750_v39 = vld [vmem:[#allocation5 + $0x6c] ss:$16 sps:$4 sm:$0xff]   ;;  %v3745_v40 = vld [vmem:[#allocation5 + $0x60] ss:$16 sps:$4 sm:$0xff]  }
  0xc0   :  { %1378 = vmatpush1.bf16.msra.mxu0 %v3661_v41  ;;  %1550 = vmatpush1.bf16.msra.mxu1 %v3664_v42  ;;  %v3748_v41 = vld [vmem:[#allocation5 + $0x68] ss:$16 sps:$4 sm:$0xff]   ;;  %v3753_v42 = vld [vmem:[#allocation5 + $0x84] ss:$16 sps:$4 sm:$0xff]  }
  0xc1   :  { %1379 = vmatprep.subr.bf16.mxu0 %v3669_v43  ;;  %1551 = vmatprep.subr.bf16.mxu1 %v3672_v44  ;;  %v3756_v43 = vld [vmem:[#allocation5 + $0x8c] ss:$16 sps:$4 sm:$0xff]   ;;  %v3751_v44 = vld [vmem:[#allocation5 + $0x80] ss:$16 sps:$4 sm:$0xff]  }
  0xc4   :  { %1380 = vmatpush1.bf16.msra.mxu0 %v3667_v45  ;;  %1552 = vmatpush1.bf16.msra.mxu1 %v3670_v46  ;;  %v3754_v45 = vld [vmem:[#allocation5 + $0x88] ss:$16 sps:$4 sm:$0xff]   ;;  %v3759_v46 = vld [vmem:[#allocation5 + $0xa4] ss:$16 sps:$4 sm:$0xff]  }
  0xc5   :  { %1381 = vmatprep.subr.bf16.mxu0 %v3675_v47  ;;  %1553 = vmatprep.subr.bf16.mxu1 %v3678_v48  ;;  %v3762_v47 = vld [vmem:[#allocation5 + $0xac] ss:$16 sps:$4 sm:$0xff]   ;;  %v3757_v48 = vld [vmem:[#allocation5 + $0xa0] ss:$16 sps:$4 sm:$0xff]  }
  0xc8   :  { %1382 = vmatpush1.bf16.msra.mxu0 %v3673_v49  ;;  %1554 = vmatpush1.bf16.msra.mxu1 %v3676_v50  ;;  %v3760_v49 = vld [vmem:[#allocation5 + $0xa8] ss:$16 sps:$4 sm:$0xff]   ;;  %v3765_v50 = vld [vmem:[#allocation5 + $0xc4] ss:$16 sps:$4 sm:$0xff]  }
  0xc9   :  { %1383 = vmatprep.subr.bf16.mxu0 %v3681_v51  ;;  %1555 = vmatprep.subr.bf16.mxu1 %v3684_v52  ;;  %v3768_v51 = vld [vmem:[#allocation5 + $0xcc] ss:$16 sps:$4 sm:$0xff]   ;;  %v3763_v52 = vld [vmem:[#allocation5 + $0xc0] ss:$16 sps:$4 sm:$0xff]  }
  0xcc   :  { %1384 = vmatpush1.bf16.msra.mxu0 %v3679_v53  ;;  %1556 = vmatpush1.bf16.msra.mxu1 %v3682_v54  ;;  %v3766_v53 = vld [vmem:[#allocation5 + $0xc8] ss:$16 sps:$4 sm:$0xff]   ;;  %v3771_v54 = vld [vmem:[#allocation5 + $0xe4] ss:$16 sps:$4 sm:$0xff]  }
  0xcd   :  { %1385 = vmatprep.subr.bf16.mxu0 %v3687_v55  ;;  %1557 = vmatprep.subr.bf16.mxu1 %v3690_v56  ;;  %v3774_v55 = vld [vmem:[#allocation5 + $0xec] ss:$16 sps:$4 sm:$0xff]   ;;  %v3769_v56 = vld [vmem:[#allocation5 + $0xe0] ss:$16 sps:$4 sm:$0xff]  }
  0xd0   :  { %1386 = vmatpush1.bf16.msra.mxu0 %v3685_v57  ;;  %1558 = vmatpush1.bf16.msra.mxu1 %v3688_v58  ;;  %v3772_v57 = vld [vmem:[#allocation5 + $0xe8] ss:$16 sps:$4 sm:$0xff]   ;;  %v3777_v58 = vld [vmem:[#allocation5 + $0x104] ss:$16 sps:$4 sm:$0xff]  }
  0xd1   :  { %1387 = vmatprep.subr.bf16.mxu0 %v3693_v59  ;;  %1559 = vmatprep.subr.bf16.mxu1 %v3696_v60  ;;  %v3780_v59 = vld [vmem:[#allocation5 + $0x10c] ss:$16 sps:$4 sm:$0xff]   ;;  %v3775_v60 = vld [vmem:[#allocation5 + $0x100] ss:$16 sps:$4 sm:$0xff]  }
  0xd4   :  { %1388 = vmatpush1.bf16.msra.mxu0 %v3691_v61  ;;  %1560 = vmatpush1.bf16.msra.mxu1 %v3694_v62  ;;  %v3778_v61 = vld [vmem:[#allocation5 + $0x108] ss:$16 sps:$4 sm:$0xff]   ;;  %v3783_v62 = vld [vmem:[#allocation5 + $0x124] ss:$16 sps:$4 sm:$0xff]  }
  0xd5   :  { %1389 = vmatprep.subr.bf16.mxu0 %v3699_v63  ;;  %1561 = vmatprep.subr.bf16.mxu1 %v3702_v0  ;;  %v3786_v63 = vld [vmem:[#allocation5 + $0x12c] ss:$16 sps:$4 sm:$0xff]   ;;  %v3781_v0 = vld [vmem:[#allocation5 + $0x120] ss:$16 sps:$4 sm:$0xff]  }
  0xd8   :  { %1390 = vmatpush1.bf16.msra.mxu0 %v3697_v1  ;;  %1562 = vmatpush1.bf16.msra.mxu1 %v3700_v2  ;;  %v3784_v1 = vld [vmem:[#allocation5 + $0x128] ss:$16 sps:$4 sm:$0xff]   ;;  %v3789_v2 = vld [vmem:[#allocation5 + $0x144] ss:$16 sps:$4 sm:$0xff]  }
  0xd9   :  { %1391 = vmatprep.subr.bf16.mxu0 %v3705_v3  ;;  %1563 = vmatprep.subr.bf16.mxu1 %v3708_v4  ;;  %v3792_v3 = vld [vmem:[#allocation5 + $0x14c] ss:$16 sps:$4 sm:$0xff]   ;;  %v3787_v4 = vld [vmem:[#allocation5 + $0x140] ss:$16 sps:$4 sm:$0xff]  }
  0xdc   :  { %1392 = vmatpush1.bf16.msra.mxu0 %v3703_v5  ;;  %1564 = vmatpush1.bf16.msra.mxu1 %v3706_v6  ;;  %v3790_v5 = vld [vmem:[#allocation5 + $0x148] ss:$16 sps:$4 sm:$0xff]   ;;  %v3795_v6 = vld [vmem:[#allocation5 + $0x164] ss:$16 sps:$4 sm:$0xff]  }
  0xdd   :  { %1393 = vmatprep.subr.bf16.mxu0 %v3711_v7  ;;  %1565 = vmatprep.subr.bf16.mxu1 %v3714_v8  ;;  %v3798_v7 = vld [vmem:[#allocation5 + $0x16c] ss:$16 sps:$4 sm:$0xff]   ;;  %v3793_v8 = vld [vmem:[#allocation5 + $0x160] ss:$16 sps:$4 sm:$0xff]  }
  0xe0   :  { %1394 = vmatpush1.bf16.msra.mxu0 %v3709_v9  ;;  %1566 = vmatpush1.bf16.msra.mxu1 %v3712_v10  ;;  %v3796_v9 = vld [vmem:[#allocation5 + $0x168] ss:$16 sps:$4 sm:$0xff]   ;;  %v3801_v10 = vld [vmem:[#allocation5 + $0x184] ss:$16 sps:$4 sm:$0xff]  }
  0xe1   :  { %1395 = vmatprep.subr.bf16.mxu0 %v3717_v11  ;;  %1567 = vmatprep.subr.bf16.mxu1 %v3720_v12  ;;  %v3804_v11 = vld [vmem:[#allocation5 + $0x18c] ss:$16 sps:$4 sm:$0xff]   ;;  %v3799_v12 = vld [vmem:[#allocation5 + $0x180] ss:$16 sps:$4 sm:$0xff]  }
  0xe4   :  { %1396 = vmatpush1.bf16.msra.mxu0 %v3715_v13  ;;  %1568 = vmatpush1.bf16.msra.mxu1 %v3718_v14  ;;  %v3802_v13 = vld [vmem:[#allocation5 + $0x188] ss:$16 sps:$4 sm:$0xff]   ;;  %v3807_v14 = vld [vmem:[#allocation5 + $0x1a4] ss:$16 sps:$4 sm:$0xff]  }
  0xe5   :  { %1408 = vmatprep.subr.bf16.mxu0 %v3723_v17  ;;  %1580 = vmatprep.subr.bf16.mxu1 %v3726_v18  ;;  %v3808_v17 = vld [vmem:[#allocation5 + $0x1a8] ss:$16 sps:$4 sm:$0xff]   ;;  %v3813_v18 = vld [vmem:[#allocation5 + $0x1c4] ss:$16 sps:$4 sm:$0xff]  }
  0xe7   :  { %1398 = vmatmul.mubr.bf16.vlgmr.msra.gmra.mrb[0].mxu0 %v74_v21  ;;  %1570 = vmatmul.mubr.bf16.vlgmr.msra.gmra.mrb[0].mxu1 %v74_v21  ;;  %v3814_v21 = vld [vmem:[#allocation5 + $0x1c8] ss:$16 sps:$4 sm:$0xff]  }
  0xe8   :  { %1409 = vmatpush1.bf16.msra.mxu0 %v3721_v19  ;;  %1581 = vmatpush1.bf16.msra.mxu1 %v3724_v20  ;;  %v3816_v19 = vld [vmem:[#allocation5 + $0x1cc] ss:$16 sps:$4 sm:$0xff]   ;;  %v3811_v20 = vld [vmem:[#allocation5 + $0x1c0] ss:$16 sps:$4 sm:$0xff]  }
  0xe9   :  { %1440 = vmatprep.mubr.bf16.mxu0 %v4027_v24  ;;  %1612 = vmatprep.mubr.bf16.mxu1 %v4027_v24  ;;  %v3817_v24 = vld [vmem:[#allocation5 + $0x1e0] ss:$16 sps:$4 sm:$0xff]  }
  0xea   :  { %2425 = vmatprep.subr.bf16.mxu0 %v3729_v22  ;;  %2511 = vmatprep.subr.bf16.mxu1 %v3732_v23  ;;  %v3819_v22 = vld [vmem:[#allocation5 + $0x1e4] ss:$16 sps:$4 sm:$0xff]   ;;  %v3822_v23 = vld [vmem:[#allocation5 + $0x1ec] ss:$16 sps:$4 sm:$0xff]  }
  0xf3   :  { %3170 = vmatmul.mubr.msk.bf16.vlgmr.msra.gmra.mrb[0].mxu0 %vm1275_vm0, %v76_v29  ;;  %3171 = vmatmul.mubr.msk.bf16.vlgmr.msra.gmra.mrb[0].mxu1 %vm1275_vm0, %v76_v29 }
  0xf4   :  { %2426 = vmatpush1.bf16.msra.mxu0 %v3727_v27  ;;  %2512 = vmatpush1.bf16.msra.mxu1 %v3730_v28  ;;  %v3828_v27 = vld [vmem:[#allocation5 + $0x20c] ss:$16 sps:$4 sm:$0xff]   ;;  %v275_v28 = vlaneseq }
  0xf5   :  { %2427 = vmatprep.subr.bf16.mxu0 %v3735_v30  ;;  %2513 = vmatprep.subr.bf16.mxu1 %v3738_v31 }
  0xf6   :  { %v4139_v29 = vshrl.u32 %v275_v28, 7  ;;  %v3862_v28 = vld [vmem:[#allocation5 + $0x2c8] ss:$16 sps:$4 sm:$0xff]  }
  0xf8   :  { %2428 = vmatpush1.bf16.msra.mxu0 %v3733_v32  ;;  %2514 = vmatpush1.bf16.msra.mxu1 %v3736_v33  ;;  %v277_v30 = vsub.s32 0, %v4139_v29  ;;  %v285_v31 = vsub.s32 2, %v4139_v29  ;;  %v273_v32 = vld [vmem:[%s4284_s2] sm:$0xf]  ;;  %v281_v33 = vsub.s32 1, %v4139_v29 }
  0xf9   :  { %2429 = vmatprep.subr.bf16.mxu0 %v3741_v34  ;;  %2515 = vmatprep.subr.bf16.mxu1 %v3744_v35  ;;  %v289_v34 = vsub.s32 3, %v4139_v29 }
  0xfa   :  { %v278_v35 = vrot.slane %v273_v32, %v277_v30 }
  0xfc   :  { %2430 = vmatpush1.bf16.msra.mxu0 %v3739_v36  ;;  %2516 = vmatpush1.bf16.msra.mxu1 %v3742_v37  ;;  %v286_v36 = vrot.slane %v273_v32, %v285_v31  ;;  %v282_v37 = vrot.slane %v273_v32, %v281_v33 }
  0xfd   :  { %2431 = vmatprep.subr.bf16.mxu0 %v3747_v38  ;;  %2517 = vmatprep.subr.bf16.mxu1 %v3750_v39  ;;  %v290_v38 = vrot.slane %v273_v32, %v289_v34  ;;  %v3867_v32 = vld [vmem:[#allocation5 + $0x2e4] ss:$16 sps:$4 sm:$0xff]  }
 0x100   :  { %2432 = vmatpush1.bf16.msra.mxu0 %v3745_v40  ;;  %2518 = vmatpush1.bf16.msra.mxu1 %v3748_v41 }
 0x101   :  { %2433 = vmatprep.subr.bf16.mxu0 %v3753_v42  ;;  %2519 = vmatprep.subr.bf16.mxu1 %v3756_v43 }
 0x104   :  { %2434 = vmatpush1.bf16.msra.mxu0 %v3751_v44  ;;  %2520 = vmatpush1.bf16.msra.mxu1 %v3754_v45 }
 0x105   :  { %2435 = vmatprep.subr.bf16.mxu0 %v3759_v46  ;;  %2521 = vmatprep.subr.bf16.mxu1 %v3762_v47 }
 0x108   :  { %2436 = vmatpush1.bf16.msra.mxu0 %v3757_v48  ;;  %2522 = vmatpush1.bf16.msra.mxu1 %v3760_v49 }
 0x109   :  { %2437 = vmatprep.subr.bf16.mxu0 %v3765_v50  ;;  %2523 = vmatprep.subr.bf16.mxu1 %v3768_v51 }
 0x10c   :  { %2438 = vmatpush1.bf16.msra.mxu0 %v3763_v52  ;;  %2524 = vmatpush1.bf16.msra.mxu1 %v3766_v53 }
 0x10d   :  { %2439 = vmatprep.subr.bf16.mxu0 %v3771_v54  ;;  %2525 = vmatprep.subr.bf16.mxu1 %v3774_v55 }
 0x110   :  { %2440 = vmatpush1.bf16.msra.mxu0 %v3769_v56  ;;  %2526 = vmatpush1.bf16.msra.mxu1 %v3772_v57 }
 0x111   :  { %2441 = vmatprep.subr.bf16.mxu0 %v3777_v58  ;;  %2527 = vmatprep.subr.bf16.mxu1 %v3780_v59 }
 0x114   :  { %2442 = vmatpush1.bf16.msra.mxu0 %v3775_v60  ;;  %2528 = vmatpush1.bf16.msra.mxu1 %v3778_v61 }
 0x115   :  { %2443 = vmatprep.subr.bf16.mxu0 %v3783_v62  ;;  %2529 = vmatprep.subr.bf16.mxu1 %v3786_v63 }
 0x118   :  { %2444 = vmatpush1.bf16.msra.mxu0 %v3781_v0  ;;  %2530 = vmatpush1.bf16.msra.mxu1 %v3784_v1 }
 0x119   :  { %2445 = vmatprep.subr.bf16.mxu0 %v3789_v2  ;;  %2531 = vmatprep.subr.bf16.mxu1 %v3792_v3  ;;  %v3823_v3 = vld [vmem:[#allocation5 + $0x200] ss:$16 sps:$4 sm:$0xff]  }
 0x11c   :  { %2446 = vmatpush1.bf16.msra.mxu0 %v3787_v4  ;;  %2532 = vmatpush1.bf16.msra.mxu1 %v3790_v5  ;;  %v3826_v4 = vld [vmem:[#allocation5 + $0x208] ss:$16 sps:$4 sm:$0xff]   ;;  %v3831_v5 = vld [vmem:[#allocation5 + $0x224] ss:$16 sps:$4 sm:$0xff]  }
 0x11d   :  { %2447 = vmatprep.subr.bf16.mxu0 %v3795_v6  ;;  %2533 = vmatprep.subr.bf16.mxu1 %v3798_v7  ;;  %v3834_v6 = vld [vmem:[#allocation5 + $0x22c] ss:$16 sps:$4 sm:$0xff]   ;;  %v3829_v7 = vld [vmem:[#allocation5 + $0x220] ss:$16 sps:$4 sm:$0xff]  }
 0x120   :  { %2448 = vmatpush1.bf16.msra.mxu0 %v3793_v8  ;;  %2534 = vmatpush1.bf16.msra.mxu1 %v3796_v9  ;;  %v3832_v8 = vld [vmem:[#allocation5 + $0x228] ss:$16 sps:$4 sm:$0xff]   ;;  %v3837_v9 = vld [vmem:[#allocation5 + $0x244] ss:$16 sps:$4 sm:$0xff]  }
 0x121   :  { %2449 = vmatprep.subr.bf16.mxu0 %v3801_v10  ;;  %2535 = vmatprep.subr.bf16.mxu1 %v3804_v11  ;;  %v3840_v10 = vld [vmem:[#allocation5 + $0x24c] ss:$16 sps:$4 sm:$0xff]   ;;  %v3835_v11 = vld [vmem:[#allocation5 + $0x240] ss:$16 sps:$4 sm:$0xff]  }
 0x124   :  { %2450 = vmatpush1.bf16.msra.mxu0 %v3799_v12  ;;  %2536 = vmatpush1.bf16.msra.mxu1 %v3802_v13  ;;  %v3838_v12 = vld [vmem:[#allocation5 + $0x248] ss:$16 sps:$4 sm:$0xff]   ;;  %v3843_v13 = vld [vmem:[#allocation5 + $0x264] ss:$16 sps:$4 sm:$0xff]  }
 0x125   :  { %2451 = vmatprep.subr.bf16.mxu0 %v3807_v14  ;;  %2537 = vmatprep.subr.bf16.mxu1 %v3810_v15  ;;  %v3846_v14 = vld [vmem:[#allocation5 + $0x26c] ss:$16 sps:$4 sm:$0xff]   ;;  %v3841_v15 = vld [vmem:[#allocation5 + $0x260] ss:$16 sps:$4 sm:$0xff]  }
 0x128   :  { %2452 = vmatpush1.bf16.msra.mxu0 %v3805_v16  ;;  %2538 = vmatpush1.bf16.msra.mxu1 %v3808_v17  ;;  %v3844_v16 = vld [vmem:[#allocation5 + $0x268] ss:$16 sps:$4 sm:$0xff]   ;;  %v3849_v17 = vld [vmem:[#allocation5 + $0x284] ss:$16 sps:$4 sm:$0xff]  }
 0x129   :  { %2453 = vmatprep.subr.bf16.mxu0 %v3813_v18  ;;  %2539 = vmatprep.subr.bf16.mxu1 %v3816_v19  ;;  %v3852_v18 = vld [vmem:[#allocation5 + $0x28c] ss:$16 sps:$4 sm:$0xff]   ;;  %v3847_v19 = vld [vmem:[#allocation5 + $0x280] ss:$16 sps:$4 sm:$0xff]  }
 0x12c   :  { %2454 = vmatpush1.bf16.msra.mxu0 %v3811_v20  ;;  %2540 = vmatpush1.bf16.msra.mxu1 %v3814_v21  ;;  %v3850_v20 = vld [vmem:[#allocation5 + $0x288] ss:$16 sps:$4 sm:$0xff]   ;;  %v3855_v21 = vld [vmem:[#allocation5 + $0x2a4] ss:$16 sps:$4 sm:$0xff]  }
 0x12d   :  { %2455 = vmatprep.subr.bf16.mxu0 %v3819_v22  ;;  %2541 = vmatprep.subr.bf16.mxu1 %v3822_v23  ;;  %v3858_v22 = vld [vmem:[#allocation5 + $0x2ac] ss:$16 sps:$4 sm:$0xff]   ;;  %v3853_v23 = vld [vmem:[#allocation5 + $0x2a0] ss:$16 sps:$4 sm:$0xff]  }
 0x130   :  { %2456 = vmatpush1.bf16.msra.mxu0 %v3817_v24  ;;  %2542 = vmatpush1.bf16.msra.mxu1 %v3820_v25  ;;  %v3856_v24 = vld [vmem:[#allocation5 + $0x2a8] ss:$16 sps:$4 sm:$0xff]   ;;  %v3861_v25 = vld [vmem:[#allocation5 + $0x2c4] ss:$16 sps:$4 sm:$0xff]  }
 0x131   :  { %2468 = vmatprep.subr.bf16.mxu0 %v3825_v26  ;;  %2554 = vmatprep.subr.bf16.mxu1 %v3828_v27  ;;  %v3864_v26 = vld [vmem:[#allocation5 + $0x2cc] ss:$16 sps:$4 sm:$0xff]   ;;  %v3859_v27 = vld [vmem:[#allocation5 + $0x2c0] ss:$16 sps:$4 sm:$0xff]  }
 0x1c6   :  { %v1442_v39 = vpop.f32.mrb[0].mxu0  ;;  %v1614_v40 = vpop.f32.mrb[0].mxu1 }
 0x1c7   :  { %v3377_v41 = vadd.f32 %v1442_v39, %v278_v35  ;;  %v3381_v42 = vadd.f32 %v1614_v40, %v286_v36  ;;  %v1444_v43 = vpop.f32.mrb[1].mxu0  ;;  %v1616_v44 = vpop.f32.mrb[1].mxu1  ;;  %v3876_v39 = vld [vmem:[#allocation5 + $0x30c] ss:$16 sps:$4 sm:$0xff]   ;;  %v3871_v40 = vld [vmem:[#allocation5 + $0x300] ss:$16 sps:$4 sm:$0xff]  }
 0x1c8   :  { %v3378_v45 = vadd.f32 %v1444_v43, %v282_v37  ;;  %v3382_v46 = vadd.f32 %v1616_v44, %v290_v38  ;;  %v1446_v47 = vpop.f32.mrb[2].mxu0  ;;  %v1618_v48 = vpop.f32.mrb[2].mxu1  ;;  %v3882_v43 = vld [vmem:[#allocation5 + $0x32c] ss:$16 sps:$4 sm:$0xff]   ;;  %v3877_v44 = vld [vmem:[#allocation5 + $0x320] ss:$16 sps:$4 sm:$0xff]  }
 0x1c9   :  { %v3379_v49 = vadd.f32 %v1446_v47, %v278_v35  ;;  %v3383_v50 = vadd.f32 %v1618_v48, %v286_v36  ;;  %v1448_v51 = vpop.f32.mrb[3].mxu0  ;;  %v1620_v52 = vpop.f32.mrb[3].mxu1  ;;  %v1623_v55 = vmax.f32 %v3377_v41, 0.0  ;;  %v1625_v56 = vmax.f32 %v3381_v42, 0.0  ;;  %v3870_v35 = vld [vmem:[#allocation5 + $0x2ec] ss:$16 sps:$4 sm:$0xff]  }
 0x1ca   :  { %v3380_v53 = vadd.f32 %v1448_v51, %v282_v37  ;;  %v3384_v54 = vadd.f32 %v1620_v52, %v290_v38  ;;  %v1624_v59 = vmax.f32 %v3378_v45, 0.0  ;;  %v1626_v60 = vmax.f32 %v3382_v46, 0.0  ;;  %v3865_v36 = vld [vmem:[#allocation5 + $0x2e0] ss:$16 sps:$4 sm:$0xff]   ;;  %v3868_v37 = vld [vmem:[#allocation5 + $0x2e8] ss:$16 sps:$4 sm:$0xff]  }
 0x1cb   :  { %v1627_v57 = vmax.f32 %v3379_v49, 0.0  ;;  %v1629_v58 = vmax.f32 %v3383_v50, 0.0  ;;  %v3873_v38 = vld [vmem:[#allocation5 + $0x304] ss:$16 sps:$4 sm:$0xff]   ;;  %v3874_v41 = vld [vmem:[#allocation5 + $0x308] ss:$16 sps:$4 sm:$0xff]  }
 0x1cc   :  { %v1628_v61 = vmax.f32 %v3380_v53, 0.0  ;;  %v1630_v62 = vmax.f32 %v3384_v54, 0.0  ;;  %v3879_v42 = vld [vmem:[#allocation5 + $0x324] ss:$16 sps:$4 sm:$0xff]   ;;  %v3880_v45 = vld [vmem:[#allocation5 + $0x328] ss:$16 sps:$4 sm:$0xff]  }
 0x1cd   :  { %v1631_v63 = vpack.c.bf16 %v1627_v57, %v1623_v55  ;;  %v4156_v0 = vpack.c.bf16 %v1629_v58, %v1625_v56  ;;  %v3885_v46 = vld [vmem:[#allocation5 + $0x344] ss:$16 sps:$4 sm:$0xff]   ;;  %v3888_v47 = vld [vmem:[#allocation5 + $0x34c] ss:$16 sps:$4 sm:$0xff]   ;;  %v3883_v48 = vld [vmem:[#allocation5 + $0x340] ss:$16 sps:$4 sm:$0xff]  }
 0x1ce   :  { %v1632_v1 = vpack.c.bf16 %v1628_v61, %v1624_v59  ;;  %v1634_v2 = vpack.c.bf16 %v1630_v62, %v1626_v60  ;;  %v3886_v49 = vld [vmem:[#allocation5 + $0x348] ss:$16 sps:$4 sm:$0xff]   ;;  %v3891_v50 = vld [vmem:[#allocation5 + $0x364] ss:$16 sps:$4 sm:$0xff]   ;;  %v3894_v51 = vld [vmem:[#allocation5 + $0x36c] ss:$16 sps:$4 sm:$0xff]  }
 0x1cf   :  { %v3889_v52 = vld [vmem:[#allocation5 + $0x360] ss:$16 sps:$4 sm:$0xff]   ;;  %v3892_v53 = vld [vmem:[#allocation5 + $0x368] ss:$16 sps:$4 sm:$0xff]   ;;  %v3897_v54 = vld [vmem:[#allocation5 + $0x384] ss:$16 sps:$4 sm:$0xff]  }
 0x1d0   :  { %2457 = vmatprep.mubr.bf16.mxu0 %v1632_v1  ;;  %2543 = vmatprep.mubr.bf16.mxu1 %v1632_v1  ;;  %v3900_v55 = vld [vmem:[#allocation5 + $0x38c] ss:$16 sps:$4 sm:$0xff]   ;;  %v3895_v56 = vld [vmem:[#allocation5 + $0x380] ss:$16 sps:$4 sm:$0xff]   ;;  %v3898_v57 = vld [vmem:[#allocation5 + $0x388] ss:$16 sps:$4 sm:$0xff]  }
 0x1d1   :  { %2458 = vmatmul.mubr.bf16.vlgmr.msra.gmra.mrb[4].mxu0 %v1631_v63  ;;  %2544 = vmatmul.mubr.bf16.vlgmr.msra.gmra.mrb[4].mxu1 %v1631_v63  ;;  %v3903_v58 = vld [vmem:[#allocation5 + $0x3a4] ss:$16 sps:$4 sm:$0xff]   ;;  %v3906_v59 = vld [vmem:[#allocation5 + $0x3ac] ss:$16 sps:$4 sm:$0xff]   ;;  %v3901_v60 = vld [vmem:[#allocation5 + $0x3a0] ss:$16 sps:$4 sm:$0xff]  }
 0x1d2   :  { %2469 = vmatpush1.bf16.msra.mxu0 %v3823_v3  ;;  %2555 = vmatpush1.bf16.msra.mxu1 %v3826_v4  ;;  %v3904_v61 = vld [vmem:[#allocation5 + $0x3a8] ss:$16 sps:$4 sm:$0xff]   ;;  %v3909_v62 = vld [vmem:[#allocation5 + $0x3c4] ss:$16 sps:$4 sm:$0xff]   ;;  %v3912_v63 = vld [vmem:[#allocation5 + $0x3cc] ss:$16 sps:$4 sm:$0xff]  }
 0x1d3   :  { %2500 = vmatprep.mubr.bf16.mxu0 %v1634_v2  ;;  %2586 = vmatprep.mubr.bf16.mxu1 %v1634_v2  ;;  %v3907_v1 = vld [vmem:[#allocation5 + $0x3c0] ss:$16 sps:$4 sm:$0xff]   ;;  %v3910_v2 = vld [vmem:[#allocation5 + $0x3c8] ss:$16 sps:$4 sm:$0xff]   ;;  %v3915_v3 = vld [vmem:[#allocation5 + $0x3e4] ss:$16 sps:$4 sm:$0xff]  }
 0x1d4   :  { %2470 = vmatprep.subr.bf16.mxu0 %v3831_v5  ;;  %2556 = vmatprep.subr.bf16.mxu1 %v3834_v6  ;;  %v3918_v4 = vld [vmem:[#allocation5 + $0x3ec] ss:$16 sps:$4 sm:$0xff]   ;;  %v3913_v5 = vld [vmem:[#allocation5 + $0x3e0] ss:$16 sps:$4 sm:$0xff]   ;;  %v3916_v6 = vld [vmem:[#allocation5 + $0x3e8] ss:$16 sps:$4 sm:$0xff]  }
 0x1d6   :  { %2471 = vmatpush1.bf16.msra.mxu0 %v3829_v7  ;;  %2557 = vmatpush1.bf16.msra.mxu1 %v3832_v8  ;;  %v3919_v7 = vld [vmem:[%s4287_s5 + $0x40] sm:$0xff]  }
 0x1d7   :  { %2472 = vmatprep.subr.bf16.mxu0 %v3837_v9  ;;  %2558 = vmatprep.subr.bf16.mxu1 %v3840_v10  ;;  %v3920_v8 = vld [vmem:[%s4287_s5 + $0xc0] sm:$0xff]  }
 0x1d8   :  { %v3921_v9 = vld [vmem:[%s4287_s5] sm:$0xff]  }
 0x1d9   :  { %v3922_v10 = vld [vmem:[%s4287_s5 + $0x80] sm:$0xff]  }
 0x1da   :  { %2473 = vmatpush1.bf16.msra.mxu0 %v3835_v11  ;;  %2559 = vmatpush1.bf16.msra.mxu1 %v3838_v12  ;;  %v3923_v11 = vld [vmem:[%s4287_s5 + $0x48] sm:$0xff]  }
 0x1db   :  { %2474 = vmatprep.subr.bf16.mxu0 %v3843_v13  ;;  %2560 = vmatprep.subr.bf16.mxu1 %v3846_v14  ;;  %v3924_v12 = vld [vmem:[%s4287_s5 + $0xc8] sm:$0xff]  }
 0x1dc   :  { %v3925_v13 = vld [vmem:[%s4287_s5 + $0x8] sm:$0xff]  }
 0x1dd   :  { %v3926_v14 = vld [vmem:[%s4287_s5 + $0x88] sm:$0xff]  }
 0x1de   :  { %2475 = vmatpush1.bf16.msra.mxu0 %v3841_v15  ;;  %2561 = vmatpush1.bf16.msra.mxu1 %v3844_v16  ;;  %v3927_v15 = vld [vmem:[%s4287_s5 + $0x50] sm:$0xff]  }
 0x1df   :  { %2476 = vmatprep.subr.bf16.mxu0 %v3849_v17  ;;  %2562 = vmatprep.subr.bf16.mxu1 %v3852_v18  ;;  %v3929_v16 = vld [vmem:[%s4287_s5 + $0x10] sm:$0xff]   ;;  %v3931_v18 = vld [vmem:[%s4287_s5 + $0x58] sm:$0xff]  }
 0x1e0   :  { %v3930_v17 = vld [vmem:[%s4287_s5 + $0x90] sm:$0xff]  }
 0x1e2   :  { %2477 = vmatpush1.bf16.msra.mxu0 %v3847_v19  ;;  %2563 = vmatpush1.bf16.msra.mxu1 %v3850_v20  ;;  %v3932_v19 = vld [vmem:[%s4287_s5 + $0xd8] sm:$0xff]  }
 0x1e3   :  { %2478 = vmatprep.subr.bf16.mxu0 %v3855_v21  ;;  %2564 = vmatprep.subr.bf16.mxu1 %v3858_v22  ;;  %v3933_v20 = vld [vmem:[%s4287_s5 + $0x18] sm:$0xff]   ;;  %v3935_v22 = vld [vmem:[%s4287_s5 + $0x60] sm:$0xff]  }
 0x1e4   :  { %v3934_v21 = vld [vmem:[%s4287_s5 + $0x98] sm:$0xff]  }
 0x1e6   :  { %2479 = vmatpush1.bf16.msra.mxu0 %v3853_v23  ;;  %2565 = vmatpush1.bf16.msra.mxu1 %v3856_v24  ;;  %v3936_v23 = vld [vmem:[%s4287_s5 + $0xe0] sm:$0xff]  }
 0x1e7   :  { %2480 = vmatprep.subr.bf16.mxu0 %v3861_v25  ;;  %2566 = vmatprep.subr.bf16.mxu1 %v3864_v26  ;;  %v3937_v24 = vld [vmem:[%s4287_s5 + $0x20] sm:$0xff]   ;;  %v3939_v26 = vld [vmem:[%s4287_s5 + $0x68] sm:$0xff]  }
 0x1e8   :  { %v3938_v25 = vld [vmem:[%s4287_s5 + $0xa0] sm:$0xff]  }
 0x1ea   :  { %2481 = vmatpush1.bf16.msra.mxu0 %v3859_v27  ;;  %2567 = vmatpush1.bf16.msra.mxu1 %v3862_v28  ;;  %v3940_v27 = vld [vmem:[%s4287_s5 + $0xe8] sm:$0xff]  }
 0x1eb   :  { %2482 = vmatprep.subr.bf16.mxu0 %v3867_v32  ;;  %2568 = vmatprep.subr.bf16.mxu1 %v3870_v35  ;;  %v3941_v28 = vld [vmem:[%s4287_s5 + $0x28] sm:$0xff]   ;;  %v3943_v35 = vld [vmem:[%s4287_s5 + $0x70] sm:$0xff]  }
 0x1ec   :  { %v3942_v32 = vld [vmem:[%s4287_s5 + $0xa8] sm:$0xff]  }
 0x1ee   :  { %2483 = vmatpush1.bf16.msra.mxu0 %v3865_v36  ;;  %2569 = vmatpush1.bf16.msra.mxu1 %v3868_v37  ;;  %v3944_v36 = vld [vmem:[%s4287_s5 + $0xf0] sm:$0xff]  }
 0x1ef   :  { %2484 = vmatprep.subr.bf16.mxu0 %v3873_v38  ;;  %2570 = vmatprep.subr.bf16.mxu1 %v3876_v39  ;;  %v3945_v37 = vld [vmem:[%s4287_s5 + $0x30] sm:$0xff]   ;;  %v3947_v39 = vld [vmem:[%s4287_s5 + $0x78] sm:$0xff]  }
 0x1f0   :  { %v3946_v38 = vld [vmem:[%s4287_s5 + $0xb0] sm:$0xff]  }
 0x1f2   :  { %2485 = vmatpush1.bf16.msra.mxu0 %v3871_v40  ;;  %2571 = vmatpush1.bf16.msra.mxu1 %v3874_v41  ;;  %v3948_v40 = vld [vmem:[%s4287_s5 + $0xf8] sm:$0xff]  }
 0x1f3   :  { %2486 = vmatprep.subr.bf16.mxu0 %v3879_v42  ;;  %2572 = vmatprep.subr.bf16.mxu1 %v3882_v43  ;;  %v3949_v41 = vld [vmem:[%s4287_s5 + $0x38] sm:$0xff]   ;;  %v1763_v43 = vld [vmem:[%s4286_s4] sm:$0xf] }
 0x1f4   :  { %v3950_v42 = vld [vmem:[%s4287_s5 + $0xb8] sm:$0xff]  }
 0x1f6   :  { %2487 = vmatpush1.bf16.msra.mxu0 %v3877_v44  ;;  %2573 = vmatpush1.bf16.msra.mxu1 %v3880_v45  ;;  %v1768_v44 = vrot.slane %v1763_v43, %v277_v30  ;;  %v1776_v45 = vrot.slane %v1763_v43, %v285_v31 }
 0x1f7   :  { %2488 = vmatprep.subr.bf16.mxu0 %v3885_v46  ;;  %2574 = vmatprep.subr.bf16.mxu1 %v3888_v47  ;;  %v1772_v46 = vrot.slane %v1763_v43, %v281_v33  ;;  %v1780_v47 = vrot.slane %v1763_v43, %v289_v34 }
 0x1fa   :  { %2489 = vmatpush1.bf16.msra.mxu0 %v3883_v48  ;;  %2575 = vmatpush1.bf16.msra.mxu1 %v3886_v49 }
 0x1fb   :  { %2490 = vmatprep.subr.bf16.mxu0 %v3891_v50  ;;  %2576 = vmatprep.subr.bf16.mxu1 %v3894_v51 }
 0x1fe   :  { %2491 = vmatpush1.bf16.msra.mxu0 %v3889_v52  ;;  %2577 = vmatpush1.bf16.msra.mxu1 %v3892_v53 }
 0x1ff   :  { %2492 = vmatprep.subr.bf16.mxu0 %v3897_v54  ;;  %2578 = vmatprep.subr.bf16.mxu1 %v3900_v55 }
 0x202   :  { %2493 = vmatpush1.bf16.msra.mxu0 %v3895_v56  ;;  %2579 = vmatpush1.bf16.msra.mxu1 %v3898_v57 }
 0x203   :  { %2494 = vmatprep.subr.bf16.mxu0 %v3903_v58  ;;  %2580 = vmatprep.subr.bf16.mxu1 %v3906_v59 }
 0x206   :  { %2495 = vmatpush1.bf16.msra.mxu0 %v3901_v60  ;;  %2581 = vmatpush1.bf16.msra.mxu1 %v3904_v61 }
 0x207   :  { %2496 = vmatprep.subr.bf16.mxu0 %v3909_v62  ;;  %2582 = vmatprep.subr.bf16.mxu1 %v3912_v63 }
 0x20a   :  { %2497 = vmatpush1.bf16.msra.mxu0 %v3907_v1  ;;  %2583 = vmatpush1.bf16.msra.mxu1 %v3910_v2 }
 0x20b   :  { %2498 = vmatprep.subr.bf16.mxu0 %v3915_v3  ;;  %2584 = vmatprep.subr.bf16.mxu1 %v3918_v4 }
 0x20e   :  { %2499 = vmatpush1.bf16.msra.mxu0 %v3913_v5  ;;  %2585 = vmatpush1.bf16.msra.mxu1 %v3916_v6 }
 0x20f   :  { %3333 = vmatprep.subr.bf16.mxu0 %v3919_v7  ;;  %3355 = vmatprep.subr.bf16.mxu1 %v3920_v8 }
 0x211   :  { %2501 = vmatmul.mubr.bf16.vlgmr.msra.gmra.mrb[4].mxu0 %v4156_v0  ;;  %2587 = vmatmul.mubr.bf16.vlgmr.msra.gmra.mrb[4].mxu1 %v4156_v0  ;;  %v3928_v0 = vld [vmem:[%s4287_s5 + $0xd0] sm:$0xff]  }
 0x212   :  { %3334 = vmatpush3.bf16.msra.mxu0 %v3921_v9  ;;  %3356 = vmatpush3.bf16.msra.mxu1 %v3922_v10  ;;  %v3300_v10 = vld [vmem:[%s4288_s6] ss:$0 sm:$0xff] }
 0x213   :  { %3335 = vmatprep.subr.bf16.mxu0 %v3923_v11  ;;  %3357 = vmatprep.subr.bf16.mxu1 %v3924_v12 }
 0x216   :  { %3336 = vmatpush3.bf16.msra.mxu0 %v3925_v13  ;;  %3358 = vmatpush3.bf16.msra.mxu1 %v3926_v14 }
 0x217   :  { %3337 = vmatprep.subr.bf16.mxu0 %v3927_v15  ;;  %3359 = vmatprep.subr.bf16.mxu1 %v3928_v0 }
 0x21a   :  { %3338 = vmatpush3.bf16.msra.mxu0 %v3929_v16  ;;  %3360 = vmatpush3.bf16.msra.mxu1 %v3930_v17 }
 0x21b   :  { %3339 = vmatprep.subr.bf16.mxu0 %v3931_v18  ;;  %3361 = vmatprep.subr.bf16.mxu1 %v3932_v19 }
 0x21e   :  { %3340 = vmatpush3.bf16.msra.mxu0 %v3933_v20  ;;  %3362 = vmatpush3.bf16.msra.mxu1 %v3934_v21 }
 0x21f   :  { %3341 = vmatprep.subr.bf16.mxu0 %v3935_v22  ;;  %3363 = vmatprep.subr.bf16.mxu1 %v3936_v23 }
 0x222   :  { %3342 = vmatpush3.bf16.msra.mxu0 %v3937_v24  ;;  %3364 = vmatpush3.bf16.msra.mxu1 %v3938_v25 }
 0x223   :  { %3343 = vmatprep.subr.bf16.mxu0 %v3939_v26  ;;  %3365 = vmatprep.subr.bf16.mxu1 %v3940_v27 }
 0x226   :  { %3344 = vmatpush3.bf16.msra.mxu0 %v3941_v28  ;;  %3366 = vmatpush3.bf16.msra.mxu1 %v3942_v32 }
 0x227   :  { %3345 = vmatprep.subr.bf16.mxu0 %v3943_v35  ;;  %3367 = vmatprep.subr.bf16.mxu1 %v3944_v36 }
 0x22a   :  { %3346 = vmatpush3.bf16.msra.mxu0 %v3945_v37  ;;  %3368 = vmatpush3.bf16.msra.mxu1 %v3946_v38 }
 0x22b   :  { %3347 = vmatprep.subr.bf16.mxu0 %v3947_v39  ;;  %3369 = vmatprep.subr.bf16.mxu1 %v3948_v40 }
 0x22e   :  { %3348 = vmatpush3.bf16.msra.mxu0 %v3949_v41  ;;  %3370 = vmatpush3.bf16.msra.mxu1 %v3950_v42 }
 0x2e4   :  { %v2502_v48 = vpop.f32.mrb[4].mxu0  ;;  %v2588_v49 = vpop.f32.mrb[4].mxu1 }
 0x2e5   :  { %v3385_v50 = vadd.f32 %v2502_v48, %v1768_v44  ;;  %v3389_v51 = vadd.f32 %v2588_v49, %v1776_v45  ;;  %v2504_v52 = vpop.f32.mrb[5].mxu0  ;;  %v2590_v53 = vpop.f32.mrb[5].mxu1 }
 0x2e6   :  { %v3386_v54 = vadd.f32 %v2504_v52, %v1772_v46  ;;  %v3390_v55 = vadd.f32 %v2590_v53, %v1780_v47  ;;  %v2506_v56 = vpop.f32.mrb[6].mxu0  ;;  %v2592_v57 = vpop.f32.mrb[6].mxu1 }
 0x2e7   :  { %v3387_v30 = vadd.f32 %v2506_v56, %v1768_v44  ;;  %v3391_v58 = vadd.f32 %v2592_v57, %v1776_v45  ;;  %v2508_v59 = vpop.f32.mrb[7].mxu0  ;;  %v2594_v31 = vpop.f32.mrb[7].mxu1  ;;  %v2597_v33 = vmax.f32 %v3385_v50, 0.0  ;;  %v2599_v62 = vmax.f32 %v3389_v51, 0.0 }
 0x2e8   :  { %v3388_v60 = vadd.f32 %v2508_v59, %v1772_v46  ;;  %v3392_v61 = vadd.f32 %v2594_v31, %v1780_v47  ;;  %v2598_v63 = vmax.f32 %v3386_v54, 0.0  ;;  %v2600_v1 = vmax.f32 %v3390_v55, 0.0 }
 0x2e9   :  { %v2601_v29 = vmax.f32 %v3387_v30, 0.0  ;;  %v2603_v34 = vmax.f32 %v3391_v58, 0.0 }
 0x2ea   :  { %v2602_v2 = vmax.f32 %v3388_v60, 0.0  ;;  %v2604_v3 = vmax.f32 %v3392_v61, 0.0 }
 0x2eb   :  { %v2605_v4 = vpack.c.bf16 %v2601_v29, %v2597_v33  ;;  %v2607_v5 = vpack.c.bf16 %v2603_v34, %v2599_v62 }
 0x2ec   :  { %v2606_v6 = vpack.c.bf16 %v2602_v2, %v2598_v63  ;;  %v2608_v7 = vpack.c.bf16 %v2604_v3, %v2600_v1 }
 0x2ee   :  { %2904 = vmatprep.mubr.bf16.mxu0 %v2606_v6  ;;  %2945 = vmatprep.mubr.bf16.mxu1 %v2608_v7 }
 0x2ef   :  { %2905 = vmatmul.mubr.bf16.vlgmr.msra.gmra.mrb[8].mxu0 %v2605_v4  ;;  %2946 = vmatmul.mubr.bf16.vlgmr.msra.gmra.mrb[8].mxu1 %v2607_v5 }
 0x3c2   :  { %v3349_v8 = vpop.f32.mrb[8].mxu0  ;;  %v3371_v9 = vpop.f32.mrb[8].mxu1 }
 0x3c3   :  { %v3350_v11 = vpop.f32.mrb[9].mxu0  ;;  %v3372_v12 = vpop.f32.mrb[9].mxu1 }
 0x3c4   :  { %v3351_v13 = vadd.f32 %v3350_v11, %v3349_v8  ;;  %v3373_v14 = vadd.f32 %v3372_v12, %v3371_v9  ;;  %v3352_v15 = vpop.f32.mrb[10].mxu0  ;;  %v3374_v0 = vpop.f32.mrb[10].mxu1 }
 0x3c5   :  { %v3353_v16 = vpop.f32.mrb[11].mxu0  ;;  %v3375_v17 = vpop.f32.mrb[11].mxu1 }
 0x3c6   :  { %v2907_v18 = vadd.f32 %v3351_v13, %v3300_v10  ;;  %v3354_v19 = vadd.f32 %v3353_v16, %v3352_v15  ;;  %v3376_v20 = vadd.f32 %v3375_v17, %v3374_v0 }
 0x3c8   :  { %v2948_v21 = vadd.f32 %v3373_v14, %v2907_v18  ;;  %v2910_v22 = vadd.f32 %v3354_v19, %v3300_v10 }
 0x3ca   :  { %2954 = vst [vmem:[#allocation7] sm:$0xff] %v2948_v21  ;;  %v2951_v23 = vadd.f32 %v3376_v20, %v2910_v22 }
 0x3cc   :  { %2955 = vst [vmem:[#allocation7 + $0x8] sm:$0xff] %v2951_v23 }
 0x3cd   :  { %2960 = vsyncadd [#allocation4], 128  ;;  %s4028_s17 = smov [#allocation7]  }
 0x3ce   :  { %s2961_s18 = sshll.u32 %s4028_s17, 4  ;;  %s2962_s18 = int_to_ptr.vmem [resolvable:$true] %s2961_s18 }
 0x3cf   :  { %s3995_s6 = scalar_lea.vmem %s2962_s18, 128  ;;  %s3999_s19 = scalar_lea.vmem %s2962_s18, 256 }
 0x3d0   :  { %p3996_p2 = scmp.ne.s32.totalorder %s2962_s18, %s3995_s6  ;;  %p4000_p3 = scmp.lt.s32.totalorder %s2962_s18, %s2962_s18 }
 0x3d1   :  { %p4001_p4 = scmp.lt.s32.totalorder %s3999_s19, %s3995_s6 }
 0x3d3   :  { %p4002_p5 = por %p4001_p4, %p4000_p3 }
 0x3d5   :  { %p4003_p6 = pnand %p4002_p5, %p3996_p2 }
 0x3d7   :  { %4006 = shalt.err (!%p4003_p6)
}
 0x3d8   :  { %s4007_s22 = scalar_lea.hbm %s4289_s7, 128 }
 0x3d9   :  { %p4008_p7 = scmp.ne.s32.totalorder %s4289_s7, %s4007_s22  ;;  %p4011_p8 = scmp.lt.u32.totalorder %s4007_s22, %s4289_s7 }
 0x3db   :  { %p4013_p9 = pnand %p4011_p8, %p4008_p7 }
 0x3dd   :  { %4016 = shalt.err (!%p4013_p9)
}
 0x3de   :  { %s4029_s3 = smov 128   ;;  %s4030_s26 = smov 8  }
 0x3df   :  { %2967 = dma.vmem_to_hbm [thread:$0]  %s2962_s18, 128, %s4289_s7, [#allocation4], %s4029_s3, %s4029_s3, %s4030_s26  }
 0x3e0   :  { %4021 = dma.done.wait [#allocation4], 256  }
 0x3e1   :  { %4022 = vsyncadd [#allocation4], 4294967040 }
 0x3e2   :  { %2971 = vsyncpa [#allocation3], 1 }
 0x3e3   :  { %2972 = vsyncpa [#allocation6], 1 }
 0x3e4   :  { %2973 = vsyncpa [#allocation4], 1 }

</bundles_post_ra>
